<compile_context>
chip_gen: v7x
topology: tpu7x:2x2x1
jax: 0.10.0
libtpu: 0.0.40
codegen_flags: <defaults>
</compile_context>

<pallas_src>
import functools

import jax
import jax.numpy as jnp
from jax import lax
from jax.experimental import pallas as pl
from jax.experimental.pallas import tpu as pltpu

LEAKY_SLOPE = 0.01   # torch.nn.LeakyReLU default
BN_EPS = 1e-5        # torch.nn.BatchNorm2d default


def _leaky(x):
    return jnp.where(x >= 0, x, LEAKY_SLOPE * x)


# --------------------------------------------------------------------------------------
# Pass A: conv as ONE im2col'd MXU matmul per tile (bf16 operands, f32 accumulate)
#         + per-tile BN1 partial sums.
# --------------------------------------------------------------------------------------
def _conv_bn1_stats_kernel(x_ref, w_ref, b_ref, y_ref, stats_ref, lhs_ref, *,
                           tile_h, out_w, kh_size, kw_size, cin):
    # x_ref:     (tile_h + KH - 1, Wp, Cin) bf16 halo band for this (batch, row-tile)
    # w_ref:     (KH*KW*Cin, Cout) bf16 folded weights;  b_ref: (1, Cout) f32
    # y_ref:     (tile_h*W, Cout)  bf16 conv output rows for this tile
    # stats_ref: (2, Cout)         f32 per-tile [sum(y), sum(y*y)] for BatchNorm #1
    # lhs_ref:   (tile_h, W, KH*KW*Cin) bf16 scratch: per-tile im2col staging buffer
    for kh in range(kh_size):                                   # static 3x3 unroll
        for kw in range(kw_size):
            k0 = (kh * kw_size + kw) * cin
            # Ref-sliced shifted window -> lane slot of the im2col scratch.
            lhs_ref[:, :, k0:k0 + cin] = x_ref[kh:kh + tile_h, kw:kw + out_w, :]
    lhs = lhs_ref[...].reshape(tile_h * out_w, kh_size * kw_size * cin)
    y = jnp.dot(lhs, w_ref[...], preferred_element_type=jnp.float32) + b_ref[...]
    stats_ref[0:1, :] = jnp.sum(y, axis=0, keepdims=True)       # f32, pre-cast
    stats_ref[1:2, :] = jnp.sum(y * y, axis=0, keepdims=True)
    y_ref[...] = y.astype(y_ref.dtype)                          # bf16 intermediate


# --------------------------------------------------------------------------------------
# Pass B: BN1 + LeakyReLU, per-tile partial sums of a and a^2 (SE pool + analytic BN2)
# --------------------------------------------------------------------------------------
def _bn1_pool_kernel(y_ref, scale1_ref, shift1_ref, part_ref):
    # y_ref: (rows_bc, Cout) bf16; scale1/shift1: (1, Cout) f32; part_ref: (2, Cout) f32
    a = _leaky(y_ref[...].astype(jnp.float32) * scale1_ref[...] + shift1_ref[...])
    part_ref[0:1, :] = jnp.sum(a, axis=0, keepdims=True)
    part_ref[1:2, :] = jnp.sum(a * a, axis=0, keepdims=True)


# --------------------------------------------------------------------------------------
# Pass C: fused BN1 + LeakyReLU + SE channel gate + BN2 + LeakyReLU apply
# --------------------------------------------------------------------------------------
def _apply_kernel(y_ref, scale1_ref, shift1_ref, gs_ref, shift2_ref, o_ref):
    a = _leaky(y_ref[...].astype(jnp.float32) * scale1_ref[...] + shift1_ref[...])
    o_ref[...] = _leaky(a * gs_ref[...] + shift2_ref[...]).astype(o_ref.dtype)


# --------------------------------------------------------------------------------------
# Tiling helpers (generation-aware)
# --------------------------------------------------------------------------------------
def _vmem_limit_bytes():
    cap = 64 * 1024 * 1024      # conservative default == v7x physical VMEM per TC
    try:
        cap = int(getattr(pltpu.get_tpu_info(), "vmem_capacity_bytes", cap))
    except Exception:
        pass
    # 128 MiB parts (v5e/v6e) -> 96 MiB scoped limit; 64 MiB parts (v7x) -> 48 MiB.
    return int(min(cap * 3 // 4, 100 * 1024 * 1024))


def _largest_tile(total, target, quantum=8):
    """Largest multiple-of-`quantum` divisor of `total` that is <= max(target, quantum)."""
    assert total % quantum == 0
    target = max(int(target), quantum)
    best = quantum
    for d in range(quantum, min(total, target) + 1, quantum):
        if total % d == 0:
            best = d
    return best


# --------------------------------------------------------------------------------------
# Forward wrapper
# --------------------------------------------------------------------------------------
def conv2d_batchnorm_forward(x_nchw, params, *, max_rows_a=None, max_rows_bc=None,
                             compute_dtype=jnp.bfloat16):
    """Forward pass.  x_nchw: (B, Cin, H, W) float32 (NCHW, like PyTorch)."""
    B, Cin, H, W = x_nchw.shape
    conv_w = params["conv_w"]                                   # (Cout, Cin, KH, KW)
    Cout, _, KH, KW = conv_w.shape
    assert KH % 2 == 1 and KW % 2 == 1, "padding='same' implemented for odd kernels"
    assert H % 8 == 0, "H must be a multiple of 8 (sublane tiling)"
    # TODO(synk): generalize tiling/masking for H not divisible by 8 and even kernels.
    ph, pw = KH // 2, KW // 2
    Wp = W + 2 * pw
    rows = B * H * W
    K9 = KH * KW * Cin
    cbytes = jnp.dtype(compute_dtype).itemsize

    vmem_limit = _vmem_limit_bytes()
    budget = vmem_limit // 2        # leave headroom for weights / Mosaic scratch

    # ---- Pass A tile: rows scale y(bf16 x2 buf) + f32 matmul result + im2col scratch.
    if max_rows_a is None:
        max_rows_a = budget // (12 * Cout + 2 * K9 + 8 * Cin)
    tile_h = _largest_tile(H, max(max_rows_a // W, 8))
    nt = H // tile_h
    band_h = tile_h + 2 * ph

    # ---- Pass B/C tile: decoupled from tile_h, large streaming blocks (HBM-bound).
    quantum_bc = 16 if (H * W) % 16 == 0 else 8     # bf16 sublane packing friendliness
    if max_rows_bc is None:
        max_rows_bc = budget // (20 * Cout)
    rows_bc = _largest_tile(H * W, max_rows_bc, quantum_bc)
    ntb = (H * W) // rows_bc

    # ---- Host-side prep (single fused XLA op chain): NCHW->NHWC, pad, cast, halo bands.
    # TODO(synk): the NCHW<->NHWC boundary transposes could be dropped entirely if the
    # surrounding model carried NHWC activations.
    x_nhwc = jnp.transpose(x_nchw, (0, 2, 3, 1))
    xpad = jnp.pad(x_nhwc, ((0, 0), (ph, ph), (pw, pw), (0, 0))).astype(compute_dtype)
    xbands = jnp.stack(
        [xpad[:, t * tile_h:t * tile_h + band_h] for t in range(nt)], axis=1,
    ).reshape(B * nt, band_h, Wp, Cin)                           # (B*nt, band_h, Wp, Cin)
    wmat = jnp.transpose(conv_w, (2, 3, 1, 0)).reshape(K9, Cout).astype(compute_dtype)
    bconv = params["conv_b"].reshape(1, Cout).astype(jnp.float32)

    cparams = pltpu.CompilerParams(
        dimension_semantics=("parallel", "parallel"),
        vmem_limit_bytes=vmem_limit,
    )

    # ---------------- Pass A: conv + BN1 partial sums --------------------------------
    conv_kernel = functools.partial(
        _conv_bn1_stats_kernel,
        tile_h=tile_h, out_w=W, kh_size=KH, kw_size=KW, cin=Cin)
    y, stats1 = pl.pallas_call(
        conv_kernel,
        grid=(B, nt),
        in_specs=[
            pl.BlockSpec((None, band_h, Wp, Cin), lambda b, t: (b * nt + t, 0, 0, 0)),
            pl.BlockSpec((K9, Cout), lambda b, t: (0, 0)),
            pl.BlockSpec((1, Cout), lambda b, t: (0, 0)),
        ],
        out_specs=[
            pl.BlockSpec((tile_h * W, Cout), lambda b, t: (b * nt + t, 0)),
            pl.BlockSpec((None, 2, Cout), lambda b, t: (b * nt + t, 0, 0)),
        ],
        out_shape=[
            jax.ShapeDtypeStruct((rows, Cout), compute_dtype),          # bf16 intermediate
            jax.ShapeDtypeStruct((B * nt, 2, Cout), jnp.float32),
        ],
        scratch_shapes=[pltpu.VMEM((tile_h, W, K9), compute_dtype)],    # im2col staging
        compiler_params=cparams,
        cost_estimate=pl.CostEstimate(
            flops=2 * rows * K9 * Cout,
            transcendentals=0,
            bytes_accessed=int(B * nt * band_h * Wp * Cin * cbytes + K9 * Cout * cbytes
                               + rows * Cout * cbytes + B * nt * 2 * Cout * 4)),
    )(xbands, wmat, bconv)

    # Finalize BN1 (training-mode biased batch stats), fold into scale/shift.
    # NOTE: single-pass E[x^2]-E[x]^2 in f32; clamped at 0 to guard tiny cancellation.
    s1 = jnp.sum(stats1[:, 0, :], axis=0)
    q1 = jnp.sum(stats1[:, 1, :], axis=0)
    mean1 = s1 / rows
    var1 = jnp.maximum(q1 / rows - mean1 * mean1, 0.0)
    scale1v = params["bn1_gamma"] * lax.rsqrt(var1 + BN_EPS)
    shift1v = params["bn1_beta"] - mean1 * scale1v
    scale1 = scale1v.reshape(1, Cout).astype(jnp.float32)
    shift1 = shift1v.reshape(1, Cout).astype(jnp.float32)

    # ---------------- Pass B: BN1 apply + per-batch partial sums ---------------------
    part = pl.pallas_call(
        _bn1_pool_kernel,
        grid=(B, ntb),
        in_specs=[
            pl.BlockSpec((rows_bc, Cout), lambda b, t: (b * ntb + t, 0)),
            pl.BlockSpec((1, Cout), lambda b, t: (0, 0)),
            pl.BlockSpec((1, Cout), lambda b, t: (0, 0)),
        ],
        out_specs=pl.BlockSpec((None, 2, Cout), lambda b, t: (b * ntb + t, 0, 0)),
        out_shape=jax.ShapeDtypeStruct((B * ntb, 2, Cout), jnp.float32),
        compiler_params=cparams,
        cost_estimate=pl.CostEstimate(
            flops=6 * rows * Cout, transcendentals=0,
            bytes_accessed=int(rows * Cout * cbytes + B * ntb * 2 * Cout * 4)),
    )(y, scale1, shift1)

    # Finalize: SE gate (tiny matmuls, done once) + analytic BN2 batch statistics.
    part_b = part.reshape(B, ntb, 2, Cout).sum(axis=1)           # (B, 2, Cout)
    sa, sq = part_b[:, 0, :], part_b[:, 1, :]
    pooled = sa / (H * W)
    z1 = _leaky(pooled @ params["fc1_w"].T + params["fc1_b"])
    gate = jax.nn.sigmoid(z1 @ params["fc2_w"].T + params["fc2_b"])      # (B, Cout)

    mean2 = jnp.sum(gate * sa, axis=0) / rows
    esq2 = jnp.sum(gate * gate * sq, axis=0) / rows
    var2 = jnp.maximum(esq2 - mean2 * mean2, 0.0)
    scale2 = params["bn2_gamma"] * lax.rsqrt(var2 + BN_EPS)
    shift2 = (params["bn2_beta"] - mean2 * scale2).reshape(1, Cout).astype(jnp.float32)
    gs = (gate * scale2[None, :]).reshape(B, 1, Cout).astype(jnp.float32)

    # ---------------- Pass C: fused BN1 + LeakyReLU + gate + BN2 + LeakyReLU ---------
    out = pl.pallas_call(
        _apply_kernel,
        grid=(B, ntb),
        in_specs=[
            pl.BlockSpec((rows_bc, Cout), lambda b, t: (b * ntb + t, 0)),
            pl.BlockSpec((1, Cout), lambda b, t: (0, 0)),
            pl.BlockSpec((1, Cout), lambda b, t: (0, 0)),
            pl.BlockSpec((None, 1, Cout), lambda b, t: (b, 0, 0)),
            pl.BlockSpec((1, Cout), lambda b, t: (0, 0)),
        ],
        out_specs=pl.BlockSpec((rows_bc, Cout), lambda b, t: (b * ntb + t, 0)),
        out_shape=jax.ShapeDtypeStruct((rows, Cout), jnp.float32),
        compiler_params=cparams,
        cost_estimate=pl.CostEstimate(
            flops=8 * rows * Cout, transcendentals=0,
            bytes_accessed=int(rows * Cout * cbytes + rows * Cout * 4)),
    )(y, scale1, shift1, gs, shift2)

    return jnp.transpose(out.reshape(B, H, W, Cout), (0, 3, 1, 2))


# --------------------------------------------------------------------------------------
# Parameters / references / self-test
# --------------------------------------------------------------------------------------
def init_params(key, num_in, num_out, kernel_size):
    """Deterministic synthetic parameters matching the PyTorch module's shapes."""
    cr = num_out // 8   # reduction_ratio = 8
    keys = jax.random.split(key, 10)
    return {
        "conv_w": 0.1 * jax.random.normal(keys[0], (num_out, num_in, kernel_size, kernel_size), jnp.float32),
        "conv_b": 0.1 * jax.random.normal(keys[1], (num_out,), jnp.float32),
        "bn1_gamma": 1.0 + 0.1 * jax.random.normal(keys[2], (num_out,), jnp.float32),
        "bn1_beta": 0.1 * jax.random.normal(keys[3], (num_out,), jnp.float32),
        "fc1_w": 0.1 * jax.random.normal(keys[4], (cr, num_out), jnp.float32),
        "fc1_b": 0.1 * jax.random.normal(keys[5], (cr,), jnp.float32),
        "fc2_w": 0.1 * jax.random.normal(keys[6], (num_out, cr), jnp.float32),
        "fc2_b": 0.1 * jax.random.normal(keys[7], (num_out,), jnp.float32),
        "bn2_gamma": 1.0 + 0.1 * jax.random.normal(keys[8], (num_out,), jnp.float32),
        "bn2_beta": 0.1 * jax.random.normal(keys[9], (num_out,), jnp.float32),
    }


def reference_forward(x, p, conv_dtype=jnp.float32, y_dtype=None):
    """Pure-JAX reference replicating the PyTorch forward (training-mode BN).
    conv_dtype=bfloat16 / y_dtype=bfloat16 mirror the kernel's MXU operand dtype and
    bf16 conv intermediate (f32 accumulation and f32 BN statistics in both cases)."""
    y = lax.conv_general_dilated(
        x.astype(conv_dtype), p["conv_w"].astype(conv_dtype),
        window_strides=(1, 1), padding="SAME",
        dimension_numbers=("NCHW", "OIHW", "NCHW"),
        preferred_element_type=jnp.float32) + p["conv_b"][None, :, None, None]

    m1 = jnp.mean(y, axis=(0, 2, 3), keepdims=True)
    v1 = jnp.mean((y - m1) ** 2, axis=(0, 2, 3), keepdims=True)
    if y_dtype is not None:
        y = y.astype(y_dtype).astype(jnp.float32)     # kernel stores y in bf16
    a = _leaky((y - m1) * lax.rsqrt(v1 + BN_EPS) * p["bn1_gamma"][None, :, None, None]
               + p["bn1_beta"][None, :, None, None])

    pooled = jnp.mean(a, axis=(2, 3))
    z1 = _leaky(pooled @ p["fc1_w"].T + p["fc1_b"])
    gate = jax.nn.sigmoid(z1 @ p["fc2_w"].T + p["fc2_b"])
    s = a * gate[:, :, None, None]

    m2 = jnp.mean(s, axis=(0, 2, 3), keepdims=True)
    v2 = jnp.mean((s - m2) ** 2, axis=(0, 2, 3), keepdims=True)
    return _leaky((s - m2) * lax.rsqrt(v2 + BN_EPS) * p["bn2_gamma"][None, :, None, None]
                  + p["bn2_beta"][None, :, None, None])


if __name__ == "__main__":
    key = jax.random.PRNGKey(0)
    kx, kp = jax.random.split(key)

    B, Cin, H, W = 2, 4, 16, 16
    Cout, ksize = 16, 3            # num_out_filters must be >= 8 (reduction_ratio)

    x = jax.random.normal(kx, (B, Cin, H, W), jnp.float32)
    params = init_params(kp, Cin, Cout, ksize)

    # Small explicit tile caps exercise multi-tile (2, 2) grids at this demo shape;
    # the defaults derive generation-aware tiles from the VMEM capacity.
    fwd = jax.jit(functools.partial(conv2d_batchnorm_forward,
                                    max_rows_a=128, max_rows_bc=128))
    out = jax.block_until_ready(fwd(x, params))
    assert out.shape == (B, Cout, H, W)

    # Strict check vs a reference that mirrors the kernel's dataflow (bf16 conv
    # operands, bf16 conv intermediate, f32 stats); loose sanity check vs the pure-f32
    # PyTorch-style reference (difference is only bf16 rounding).
    ref_mirror = reference_forward(x, params, conv_dtype=jnp.bfloat16, y_dtype=jnp.bfloat16)
    ref_f32 = reference_forward(x, params)
    err_strict = float(jnp.max(jnp.abs(out - ref_mirror)))
    err_f32 = float(jnp.max(jnp.abs(out - ref_f32)))
    if err_strict > 2e-3:
        raise AssertionError(f"mismatch vs bf16-mirror reference: max abs err = {err_strict}")
    if err_f32 > 5e-2:
        raise AssertionError(f"mismatch vs f32 reference: max abs err = {err_f32}")

    print("KERNEL_OK")
</pallas_src>

<mosaic_0001>
module attributes {stable_mosaic.version = 11 : i64} {
  func.func @_conv_bn1_stats_kernel(%arg0: i32, %arg1: i32, %arg2: memref<1x10x18x4xbf16, #tpu.memory_space<vmem>>, %arg3: memref<36x16xbf16, #tpu.memory_space<vmem>>, %arg4: memref<1x16xf32, #tpu.memory_space<vmem>>, %arg5: memref<128x16xbf16, #tpu.memory_space<vmem>>, %arg6: memref<1x2x16xf32, #tpu.memory_space<vmem>>, %arg7: memref<8x16x36xbf16, #tpu.memory_space<vmem>>) attributes {dimension_semantics = [#tpu.dimension_semantics<parallel>, #tpu.dimension_semantics<parallel>], iteration_bounds = array<i64: 2, 2>, scalar_prefetch = 0 : i64, scratch_operands = 1 : i64, tpu.core_type = #tpu.core_type<tc>, window_params = [{transform_indices = @transform_0, window_bounds = array<i64: 1, 10, 18, 4>}, {pipeline_mode = #tpu.pipeline_mode<synchronous>, transform_indices = @transform_1, window_bounds = array<i64: 36, 16>}, {pipeline_mode = #tpu.pipeline_mode<synchronous>, transform_indices = @transform_2, window_bounds = array<i64: 1, 16>}, {transform_indices = @transform_3, window_bounds = array<i64: 128, 16>}, {transform_indices = @transform_4, window_bounds = array<i64: 1, 2, 16>}]} {
    %c0 = arith.constant 0 : index
    %c0_0 = arith.constant 0 : index
    %c0_1 = arith.constant 0 : index
    %c0_2 = arith.constant 0 : index
    %0 = vector.load %arg2[%c0, %c0_0, %c0_1, %c0_2] : memref<1x10x18x4xbf16, #tpu.memory_space<vmem>>, vector<1x8x16x4xbf16>
    %1 = vector.shape_cast %0 : vector<1x8x16x4xbf16> to vector<8x16x4xbf16>
    %c0_3 = arith.constant 0 : index
    %c0_4 = arith.constant 0 : index
    %c0_5 = arith.constant 0 : index
    %2 = vector.load %arg7[%c0_3, %c0_4, %c0_5] : memref<8x16x36xbf16, #tpu.memory_space<vmem>>, vector<8x16x4xbf16>
    tpu.vector_store %arg7[%c0_3, %c0_4, %c0_5], %1 {strides = array<i32>} : memref<8x16x36xbf16, #tpu.memory_space<vmem>>, vector<8x16x4xbf16>,
    %c0_6 = arith.constant 0 : index
    %c0_7 = arith.constant 0 : index
    %c1 = arith.constant 1 : index
    %c0_8 = arith.constant 0 : index
    %3 = vector.load %arg2[%c0_6, %c0_7, %c1, %c0_8] : memref<1x10x18x4xbf16, #tpu.memory_space<vmem>>, vector<1x8x16x4xbf16>
    %4 = vector.shape_cast %3 : vector<1x8x16x4xbf16> to vector<8x16x4xbf16>
    %c0_9 = arith.constant 0 : index
    %c0_10 = arith.constant 0 : index
    %c4 = arith.constant 4 : index
    %5 = vector.load %arg7[%c0_9, %c0_10, %c4] : memref<8x16x36xbf16, #tpu.memory_space<vmem>>, vector<8x16x4xbf16>
    tpu.vector_store %arg7[%c0_9, %c0_10, %c4], %4 {strides = array<i32>} : memref<8x16x36xbf16, #tpu.memory_space<vmem>>, vector<8x16x4xbf16>,
    %c0_11 = arith.constant 0 : index
    %c0_12 = arith.constant 0 : index
    %c2 = arith.constant 2 : index
    %c0_13 = arith.constant 0 : index
    %6 = vector.load %arg2[%c0_11, %c0_12, %c2, %c0_13] : memref<1x10x18x4xbf16, #tpu.memory_space<vmem>>, vector<1x8x16x4xbf16>
    %7 = vector.shape_cast %6 : vector<1x8x16x4xbf16> to vector<8x16x4xbf16>
    %c0_14 = arith.constant 0 : index
    %c0_15 = arith.constant 0 : index
    %c8 = arith.constant 8 : index
    %8 = vector.load %arg7[%c0_14, %c0_15, %c8] : memref<8x16x36xbf16, #tpu.memory_space<vmem>>, vector<8x16x4xbf16>
    tpu.vector_store %arg7[%c0_14, %c0_15, %c8], %7 {strides = array<i32>} : memref<8x16x36xbf16, #tpu.memory_space<vmem>>, vector<8x16x4xbf16>,
    %c0_16 = arith.constant 0 : index
    %c1_17 = arith.constant 1 : index
    %c0_18 = arith.constant 0 : index
    %c0_19 = arith.constant 0 : index
    %9 = vector.load %arg2[%c0_16, %c1_17, %c0_18, %c0_19] : memref<1x10x18x4xbf16, #tpu.memory_space<vmem>>, vector<1x8x16x4xbf16>
    %10 = vector.shape_cast %9 : vector<1x8x16x4xbf16> to vector<8x16x4xbf16>
    %c0_20 = arith.constant 0 : index
    %c0_21 = arith.constant 0 : index
    %c12 = arith.constant 12 : index
    %11 = vector.load %arg7[%c0_20, %c0_21, %c12] : memref<8x16x36xbf16, #tpu.memory_space<vmem>>, vector<8x16x4xbf16>
    tpu.vector_store %arg7[%c0_20, %c0_21, %c12], %10 {strides = array<i32>} : memref<8x16x36xbf16, #tpu.memory_space<vmem>>, vector<8x16x4xbf16>,
    %c0_22 = arith.constant 0 : index
    %c1_23 = arith.constant 1 : index
    %c1_24 = arith.constant 1 : index
    %c0_25 = arith.constant 0 : index
    %12 = vector.load %arg2[%c0_22, %c1_23, %c1_24, %c0_25] : memref<1x10x18x4xbf16, #tpu.memory_space<vmem>>, vector<1x8x16x4xbf16>
    %13 = vector.shape_cast %12 : vector<1x8x16x4xbf16> to vector<8x16x4xbf16>
    %c0_26 = arith.constant 0 : index
    %c0_27 = arith.constant 0 : index
    %c16 = arith.constant 16 : index
    %14 = vector.load %arg7[%c0_26, %c0_27, %c16] : memref<8x16x36xbf16, #tpu.memory_space<vmem>>, vector<8x16x4xbf16>
    tpu.vector_store %arg7[%c0_26, %c0_27, %c16], %13 {strides = array<i32>} : memref<8x16x36xbf16, #tpu.memory_space<vmem>>, vector<8x16x4xbf16>,
    %c0_28 = arith.constant 0 : index
    %c1_29 = arith.constant 1 : index
    %c2_30 = arith.constant 2 : index
    %c0_31 = arith.constant 0 : index
    %15 = vector.load %arg2[%c0_28, %c1_29, %c2_30, %c0_31] : memref<1x10x18x4xbf16, #tpu.memory_space<vmem>>, vector<1x8x16x4xbf16>
    %16 = vector.shape_cast %15 : vector<1x8x16x4xbf16> to vector<8x16x4xbf16>
    %c0_32 = arith.constant 0 : index
    %c0_33 = arith.constant 0 : index
    %c20 = arith.constant 20 : index
    %17 = vector.load %arg7[%c0_32, %c0_33, %c20] : memref<8x16x36xbf16, #tpu.memory_space<vmem>>, vector<8x16x4xbf16>
    tpu.vector_store %arg7[%c0_32, %c0_33, %c20], %16 {strides = array<i32>} : memref<8x16x36xbf16, #tpu.memory_space<vmem>>, vector<8x16x4xbf16>,
    %c0_34 = arith.constant 0 : index
    %c2_35 = arith.constant 2 : index
    %c0_36 = arith.constant 0 : index
    %c0_37 = arith.constant 0 : index
    %18 = vector.load %arg2[%c0_34, %c2_35, %c0_36, %c0_37] : memref<1x10x18x4xbf16, #tpu.memory_space<vmem>>, vector<1x8x16x4xbf16>
    %19 = vector.shape_cast %18 : vector<1x8x16x4xbf16> to vector<8x16x4xbf16>
    %c0_38 = arith.constant 0 : index
    %c0_39 = arith.constant 0 : index
    %c24 = arith.constant 24 : index
    %20 = vector.load %arg7[%c0_38, %c0_39, %c24] : memref<8x16x36xbf16, #tpu.memory_space<vmem>>, vector<8x16x4xbf16>
    tpu.vector_store %arg7[%c0_38, %c0_39, %c24], %19 {strides = array<i32>} : memref<8x16x36xbf16, #tpu.memory_space<vmem>>, vector<8x16x4xbf16>,
    %c0_40 = arith.constant 0 : index
    %c2_41 = arith.constant 2 : index
    %c1_42 = arith.constant 1 : index
    %c0_43 = arith.constant 0 : index
    %21 = vector.load %arg2[%c0_40, %c2_41, %c1_42, %c0_43] : memref<1x10x18x4xbf16, #tpu.memory_space<vmem>>, vector<1x8x16x4xbf16>
    %22 = vector.shape_cast %21 : vector<1x8x16x4xbf16> to vector<8x16x4xbf16>
    %c0_44 = arith.constant 0 : index
    %c0_45 = arith.constant 0 : index
    %c28 = arith.constant 28 : index
    %23 = vector.load %arg7[%c0_44, %c0_45, %c28] : memref<8x16x36xbf16, #tpu.memory_space<vmem>>, vector<8x16x4xbf16>
    tpu.vector_store %arg7[%c0_44, %c0_45, %c28], %22 {strides = array<i32>} : memref<8x16x36xbf16, #tpu.memory_space<vmem>>, vector<8x16x4xbf16>,
    %c0_46 = arith.constant 0 : index
    %c2_47 = arith.constant 2 : index
    %c2_48 = arith.constant 2 : index
    %c0_49 = arith.constant 0 : index
    %24 = vector.load %arg2[%c0_46, %c2_47, %c2_48, %c0_49] : memref<1x10x18x4xbf16, #tpu.memory_space<vmem>>, vector<1x8x16x4xbf16>
    %25 = vector.shape_cast %24 : vector<1x8x16x4xbf16> to vector<8x16x4xbf16>
    %c0_50 = arith.constant 0 : index
    %c0_51 = arith.constant 0 : index
    %c32 = arith.constant 32 : index
    %26 = vector.load %arg7[%c0_50, %c0_51, %c32] : memref<8x16x36xbf16, #tpu.memory_space<vmem>>, vector<8x16x4xbf16>
    tpu.vector_store %arg7[%c0_50, %c0_51, %c32], %25 {strides = array<i32>} : memref<8x16x36xbf16, #tpu.memory_space<vmem>>, vector<8x16x4xbf16>,
    %c0_52 = arith.constant 0 : index
    %c0_53 = arith.constant 0 : index
    %c0_54 = arith.constant 0 : index
    %27 = vector.load %arg7[%c0_52, %c0_53, %c0_54] : memref<8x16x36xbf16, #tpu.memory_space<vmem>>, vector<8x16x36xbf16>
    %28 = vector.shape_cast %27 : vector<8x16x36xbf16> to vector<128x36xbf16>
    %c0_55 = arith.constant 0 : index
    %c0_56 = arith.constant 0 : index
    %29 = vector.load %arg3[%c0_55, %c0_56] : memref<36x16xbf16, #tpu.memory_space<vmem>>, vector<36x16xbf16>
    %cst = arith.constant dense<0.000000e+00> : vector<128x16xf32>
    %30 = tpu.matmul %28, %29, %cst {dimension_numbers = #tpu.dot_dimension_numbers<[1], [0], [0], [1], [0, 0, 1, 1], [], []>} : vector<128x36xbf16>, vector<36x16xbf16>, vector<128x16xf32> -> vector<128x16xf32>
    %c0_57 = arith.constant 0 : index
    %c0_58 = arith.constant 0 : index
    %31 = vector.load %arg4[%c0_57, %c0_58] : memref<1x16xf32, #tpu.memory_space<vmem>>, vector<1x16xf32>
    %32 = vector.broadcast %31 : vector<1x16xf32> to vector<128x16xf32>
    %33 = arith.addf %30, %32 : vector<128x16xf32>
    %cst_59 = arith.constant dense<0.000000e+00> : vector<16xf32>
    %34 = vector.multi_reduction <add>, %33, %cst_59 [0] : vector<128x16xf32> to vector<16xf32>
    %35 = vector.shape_cast %34 : vector<16xf32> to vector<1x16xf32>
    %c0_60 = arith.constant 0 : index
    %c0_61 = arith.constant 0 : index
    %c0_62 = arith.constant 0 : index
    %36 = vector.load %arg6[%c0_60, %c0_61, %c0_62] : memref<1x2x16xf32, #tpu.memory_space<vmem>>, vector<1x1x16xf32>
    %37 = vector.shape_cast %36 : vector<1x1x16xf32> to vector<1x16xf32>
    %38 = vector.shape_cast %35 : vector<1x16xf32> to vector<1x1x16xf32>
    tpu.vector_store %arg6[%c0_60, %c0_61, %c0_62], %38 {strides = array<i32>} : memref<1x2x16xf32, #tpu.memory_space<vmem>>, vector<1x1x16xf32>,
    %39 = arith.mulf %33, %33 : vector<128x16xf32>
    %cst_63 = arith.constant dense<0.000000e+00> : vector<16xf32>
    %40 = vector.multi_reduction <add>, %39, %cst_63 [0] : vector<128x16xf32> to vector<16xf32>
    %41 = vector.shape_cast %40 : vector<16xf32> to vector<1x16xf32>
    %c0_64 = arith.constant 0 : index
    %c1_65 = arith.constant 1 : index
    %c0_66 = arith.constant 0 : index
    %42 = vector.load %arg6[%c0_64, %c1_65, %c0_66] : memref<1x2x16xf32, #tpu.memory_space<vmem>>, vector<1x1x16xf32>
    %43 = vector.shape_cast %42 : vector<1x1x16xf32> to vector<1x16xf32>
    %44 = vector.shape_cast %41 : vector<1x16xf32> to vector<1x1x16xf32>
    tpu.vector_store %arg6[%c0_64, %c1_65, %c0_66], %44 {strides = array<i32>} : memref<1x2x16xf32, #tpu.memory_space<vmem>>, vector<1x1x16xf32>,
    %45 = arith.truncf %33 : vector<128x16xf32> to vector<128x16xbf16>
    %c0_67 = arith.constant 0 : index
    %c0_68 = arith.constant 0 : index
    %46 = vector.load %arg5[%c0_67, %c0_68] : memref<128x16xbf16, #tpu.memory_space<vmem>>, vector<128x16xbf16>
    tpu.vector_store %arg5[%c0_67, %c0_68], %45 {strides = array<i32>} : memref<128x16xbf16, #tpu.memory_space<vmem>>, vector<128x16xbf16>,
    return
  }
  func.func @transform_0(%arg0: i32, %arg1: i32) -> (i32, i32, i32, i32) {
    %c2_i32 = arith.constant 2 : i32
    %0 = arith.muli %arg0, %c2_i32 : i32
    %1 = arith.addi %0, %arg1 : i32
    %c0_i32 = arith.constant 0 : i32
    %c0_i32_0 = arith.constant 0 : i32
    %c0_i32_1 = arith.constant 0 : i32
    %c0_i32_2 = arith.constant 0 : i32
    return %1, %c0_i32, %c0_i32_0, %c0_i32_1 : i32, i32, i32, i32
  }
  func.func @transform_1(%arg0: i32, %arg1: i32) -> (i32, i32) {
    %c0_i32 = arith.constant 0 : i32
    %c0_i32_0 = arith.constant 0 : i32
    %c0_i32_1 = arith.constant 0 : i32
    return %c0_i32, %c0_i32_0 : i32, i32
  }
  func.func @transform_2(%arg0: i32, %arg1: i32) -> (i32, i32) {
    %c0_i32 = arith.constant 0 : i32
    %c0_i32_0 = arith.constant 0 : i32
    %c0_i32_1 = arith.constant 0 : i32
    return %c0_i32, %c0_i32_0 : i32, i32
  }
  func.func @transform_3(%arg0: i32, %arg1: i32) -> (i32, i32) {
    %c2_i32 = arith.constant 2 : i32
    %0 = arith.muli %arg0, %c2_i32 : i32
    %1 = arith.addi %0, %arg1 : i32
    %c0_i32 = arith.constant 0 : i32
    %c0_i32_0 = arith.constant 0 : i32
    return %1, %c0_i32 : i32, i32
  }
  func.func @transform_4(%arg0: i32, %arg1: i32) -> (i32, i32, i32) {
    %c2_i32 = arith.constant 2 : i32
    %0 = arith.muli %arg0, %c2_i32 : i32
    %1 = arith.addi %0, %arg1 : i32
    %c0_i32 = arith.constant 0 : i32
    %c0_i32_0 = arith.constant 0 : i32
    %c0_i32_1 = arith.constant 0 : i32
    return %1, %c0_i32, %c0_i32_0 : i32, i32, i32
  }
}

module attributes {stable_mosaic.version = 11 : i64} {
  func.func @_bn1_pool_kernel(%arg0: i32, %arg1: i32, %arg2: memref<128x16xbf16, #tpu.memory_space<vmem>>, %arg3: memref<1x16xf32, #tpu.memory_space<vmem>>, %arg4: memref<1x16xf32, #tpu.memory_space<vmem>>, %arg5: memref<1x2x16xf32, #tpu.memory_space<vmem>>) attributes {dimension_semantics = [#tpu.dimension_semantics<parallel>, #tpu.dimension_semantics<parallel>], iteration_bounds = array<i64: 2, 2>, scalar_prefetch = 0 : i64, scratch_operands = 0 : i64, tpu.core_type = #tpu.core_type<tc>, window_params = [{transform_indices = @transform_0, window_bounds = array<i64: 128, 16>}, {pipeline_mode = #tpu.pipeline_mode<synchronous>, transform_indices = @transform_1, window_bounds = array<i64: 1, 16>}, {pipeline_mode = #tpu.pipeline_mode<synchronous>, transform_indices = @transform_2, window_bounds = array<i64: 1, 16>}, {transform_indices = @transform_3, window_bounds = array<i64: 1, 2, 16>}]} {
    %c0 = arith.constant 0 : index
    %c0_0 = arith.constant 0 : index
    %0 = vector.load %arg2[%c0, %c0_0] : memref<128x16xbf16, #tpu.memory_space<vmem>>, vector<128x16xbf16>
    %1 = arith.extf %0 : vector<128x16xbf16> to vector<128x16xf32>
    %c0_1 = arith.constant 0 : index
    %c0_2 = arith.constant 0 : index
    %2 = vector.load %arg3[%c0_1, %c0_2] : memref<1x16xf32, #tpu.memory_space<vmem>>, vector<1x16xf32>
    %3 = vector.broadcast %2 : vector<1x16xf32> to vector<128x16xf32>
    %4 = arith.mulf %1, %3 : vector<128x16xf32>
    %c0_3 = arith.constant 0 : index
    %c0_4 = arith.constant 0 : index
    %5 = vector.load %arg4[%c0_3, %c0_4] : memref<1x16xf32, #tpu.memory_space<vmem>>, vector<1x16xf32>
    %6 = vector.broadcast %5 : vector<1x16xf32> to vector<128x16xf32>
    %7 = arith.addf %4, %6 : vector<128x16xf32>
    %cst = arith.constant 0.000000e+00 : f32
    %8 = vector.broadcast %cst : f32 to vector<128x16xf32>
    %9 = arith.cmpf oge, %7, %8 : vector<128x16xf32>
    %cst_5 = arith.constant 0.00999999977 : f32
    %10 = vector.broadcast %cst_5 : f32 to vector<128x16xf32>
    %11 = arith.mulf %10, %7 : vector<128x16xf32>
    %12 = arith.select %9, %7, %11 : vector<128x16xi1>, vector<128x16xf32>
    %cst_6 = arith.constant dense<0.000000e+00> : vector<16xf32>
    %13 = vector.multi_reduction <add>, %12, %cst_6 [0] : vector<128x16xf32> to vector<16xf32>
    %14 = vector.shape_cast %13 : vector<16xf32> to vector<1x16xf32>
    %c0_7 = arith.constant 0 : index
    %c0_8 = arith.constant 0 : index
    %c0_9 = arith.constant 0 : index
    %15 = vector.load %arg5[%c0_7, %c0_8, %c0_9] : memref<1x2x16xf32, #tpu.memory_space<vmem>>, vector<1x1x16xf32>
    %16 = vector.shape_cast %15 : vector<1x1x16xf32> to vector<1x16xf32>
    %17 = vector.shape_cast %14 : vector<1x16xf32> to vector<1x1x16xf32>
    tpu.vector_store %arg5[%c0_7, %c0_8, %c0_9], %17 {strides = array<i32>} : memref<1x2x16xf32, #tpu.memory_space<vmem>>, vector<1x1x16xf32>,
    %18 = arith.mulf %12, %12 : vector<128x16xf32>
    %cst_10 = arith.constant dense<0.000000e+00> : vector<16xf32>
    %19 = vector.multi_reduction <add>, %18, %cst_10 [0] : vector<128x16xf32> to vector<16xf32>
    %20 = vector.shape_cast %19 : vector<16xf32> to vector<1x16xf32>
    %c0_11 = arith.constant 0 : index
    %c1 = arith.constant 1 : index
    %c0_12 = arith.constant 0 : index
    %21 = vector.load %arg5[%c0_11, %c1, %c0_12] : memref<1x2x16xf32, #tpu.memory_space<vmem>>, vector<1x1x16xf32>
    %22 = vector.shape_cast %21 : vector<1x1x16xf32> to vector<1x16xf32>
    %23 = vector.shape_cast %20 : vector<1x16xf32> to vector<1x1x16xf32>
    tpu.vector_store %arg5[%c0_11, %c1, %c0_12], %23 {strides = array<i32>} : memref<1x2x16xf32, #tpu.memory_space<vmem>>, vector<1x1x16xf32>,
    return
  }
  func.func @transform_0(%arg0: i32, %arg1: i32) -> (i32, i32) {
    %c2_i32 = arith.constant 2 : i32
    %0 = arith.muli %arg0, %c2_i32 : i32
    %1 = arith.addi %0, %arg1 : i32
    %c0_i32 = arith.constant 0 : i32
    %c0_i32_0 = arith.constant 0 : i32
    return %1, %c0_i32 : i32, i32
  }
  func.func @transform_1(%arg0: i32, %arg1: i32) -> (i32, i32) {
    %c0_i32 = arith.constant 0 : i32
    %c0_i32_0 = arith.constant 0 : i32
    %c0_i32_1 = arith.constant 0 : i32
    return %c0_i32, %c0_i32_0 : i32, i32
  }
  func.func @transform_2(%arg0: i32, %arg1: i32) -> (i32, i32) {
    %c0_i32 = arith.constant 0 : i32
    %c0_i32_0 = arith.constant 0 : i32
    %c0_i32_1 = arith.constant 0 : i32
    return %c0_i32, %c0_i32_0 : i32, i32
  }
  func.func @transform_3(%arg0: i32, %arg1: i32) -> (i32, i32, i32) {
    %c2_i32 = arith.constant 2 : i32
    %0 = arith.muli %arg0, %c2_i32 : i32
    %1 = arith.addi %0, %arg1 : i32
    %c0_i32 = arith.constant 0 : i32
    %c0_i32_0 = arith.constant 0 : i32
    %c0_i32_1 = arith.constant 0 : i32
    return %1, %c0_i32, %c0_i32_0 : i32, i32, i32
  }
}

module attributes {stable_mosaic.version = 11 : i64} {
  func.func @_apply_kernel(%arg0: i32, %arg1: i32, %arg2: memref<128x16xbf16, #tpu.memory_space<vmem>>, %arg3: memref<1x16xf32, #tpu.memory_space<vmem>>, %arg4: memref<1x16xf32, #tpu.memory_space<vmem>>, %arg5: memref<1x1x16xf32, #tpu.memory_space<vmem>>, %arg6: memref<1x16xf32, #tpu.memory_space<vmem>>, %arg7: memref<128x16xf32, #tpu.memory_space<vmem>>) attributes {dimension_semantics = [#tpu.dimension_semantics<parallel>, #tpu.dimension_semantics<parallel>], iteration_bounds = array<i64: 2, 2>, scalar_prefetch = 0 : i64, scratch_operands = 0 : i64, tpu.core_type = #tpu.core_type<tc>, window_params = [{transform_indices = @transform_0, window_bounds = array<i64: 128, 16>}, {pipeline_mode = #tpu.pipeline_mode<synchronous>, transform_indices = @transform_1, window_bounds = array<i64: 1, 16>}, {pipeline_mode = #tpu.pipeline_mode<synchronous>, transform_indices = @transform_2, window_bounds = array<i64: 1, 16>}, {transform_indices = @transform_3, window_bounds = array<i64: 1, 1, 16>}, {pipeline_mode = #tpu.pipeline_mode<synchronous>, transform_indices = @transform_4, window_bounds = array<i64: 1, 16>}, {transform_indices = @transform_5, window_bounds = array<i64: 128, 16>}]} {
    %c0 = arith.constant 0 : index
    %c0_0 = arith.constant 0 : index
    %0 = vector.load %arg2[%c0, %c0_0] : memref<128x16xbf16, #tpu.memory_space<vmem>>, vector<128x16xbf16>
    %1 = arith.extf %0 : vector<128x16xbf16> to vector<128x16xf32>
    %c0_1 = arith.constant 0 : index
    %c0_2 = arith.constant 0 : index
    %2 = vector.load %arg3[%c0_1, %c0_2] : memref<1x16xf32, #tpu.memory_space<vmem>>, vector<1x16xf32>
    %3 = vector.broadcast %2 : vector<1x16xf32> to vector<128x16xf32>
    %4 = arith.mulf %1, %3 : vector<128x16xf32>
    %c0_3 = arith.constant 0 : index
    %c0_4 = arith.constant 0 : index
    %5 = vector.load %arg4[%c0_3, %c0_4] : memref<1x16xf32, #tpu.memory_space<vmem>>, vector<1x16xf32>
    %6 = vector.broadcast %5 : vector<1x16xf32> to vector<128x16xf32>
    %7 = arith.addf %4, %6 : vector<128x16xf32>
    %cst = arith.constant 0.000000e+00 : f32
    %8 = vector.broadcast %cst : f32 to vector<128x16xf32>
    %9 = arith.cmpf oge, %7, %8 : vector<128x16xf32>
    %cst_5 = arith.constant 0.00999999977 : f32
    %10 = vector.broadcast %cst_5 : f32 to vector<128x16xf32>
    %11 = arith.mulf %10, %7 : vector<128x16xf32>
    %12 = arith.select %9, %7, %11 : vector<128x16xi1>, vector<128x16xf32>
    %c0_6 = arith.constant 0 : index
    %c0_7 = arith.constant 0 : index
    %c0_8 = arith.constant 0 : index
    %13 = vector.load %arg5[%c0_6, %c0_7, %c0_8] : memref<1x1x16xf32, #tpu.memory_space<vmem>>, vector<1x1x16xf32>
    %14 = vector.shape_cast %13 : vector<1x1x16xf32> to vector<1x16xf32>
    %15 = vector.broadcast %14 : vector<1x16xf32> to vector<128x16xf32>
    %16 = arith.mulf %12, %15 : vector<128x16xf32>
    %c0_9 = arith.constant 0 : index
    %c0_10 = arith.constant 0 : index
    %17 = vector.load %arg6[%c0_9, %c0_10] : memref<1x16xf32, #tpu.memory_space<vmem>>, vector<1x16xf32>
    %18 = vector.broadcast %17 : vector<1x16xf32> to vector<128x16xf32>
    %19 = arith.addf %16, %18 : vector<128x16xf32>
    %cst_11 = arith.constant 0.000000e+00 : f32
    %20 = vector.broadcast %cst_11 : f32 to vector<128x16xf32>
    %21 = arith.cmpf oge, %19, %20 : vector<128x16xf32>
    %cst_12 = arith.constant 0.00999999977 : f32
    %22 = vector.broadcast %cst_12 : f32 to vector<128x16xf32>
    %23 = arith.mulf %22, %19 : vector<128x16xf32>
    %24 = arith.select %21, %19, %23 : vector<128x16xi1>, vector<128x16xf32>
    %c0_13 = arith.constant 0 : index
    %c0_14 = arith.constant 0 : index
    %25 = vector.load %arg7[%c0_13, %c0_14] : memref<128x16xf32, #tpu.memory_space<vmem>>, vector<128x16xf32>
    tpu.vector_store %arg7[%c0_13, %c0_14], %24 {strides = array<i32>} : memref<128x16xf32, #tpu.memory_space<vmem>>, vector<128x16xf32>,
    return
  }
  func.func @transform_0(%arg0: i32, %arg1: i32) -> (i32, i32) {
    %c2_i32 = arith.constant 2 : i32
    %0 = arith.muli %arg0, %c2_i32 : i32
    %1 = arith.addi %0, %arg1 : i32
    %c0_i32 = arith.constant 0 : i32
    %c0_i32_0 = arith.constant 0 : i32
    return %1, %c0_i32 : i32, i32
  }
  func.func @transform_1(%arg0: i32, %arg1: i32) -> (i32, i32) {
    %c0_i32 = arith.constant 0 : i32
    %c0_i32_0 = arith.constant 0 : i32
    %c0_i32_1 = arith.constant 0 : i32
    return %c0_i32, %c0_i32_0 : i32, i32
  }
  func.func @transform_2(%arg0: i32, %arg1: i32) -> (i32, i32) {
    %c0_i32 = arith.constant 0 : i32
    %c0_i32_0 = arith.constant 0 : i32
    %c0_i32_1 = arith.constant 0 : i32
    return %c0_i32, %c0_i32_0 : i32, i32
  }
  func.func @transform_3(%arg0: i32, %arg1: i32) -> (i32, i32, i32) {
    %c0_i32 = arith.constant 0 : i32
    %c0_i32_0 = arith.constant 0 : i32
    %c0_i32_1 = arith.constant 0 : i32
    return %arg0, %c0_i32, %c0_i32_0 : i32, i32, i32
  }
  func.func @transform_4(%arg0: i32, %arg1: i32) -> (i32, i32) {
    %c0_i32 = arith.constant 0 : i32
    %c0_i32_0 = arith.constant 0 : i32
    %c0_i32_1 = arith.constant 0 : i32
    return %c0_i32, %c0_i32_0 : i32, i32
  }
  func.func @transform_5(%arg0: i32, %arg1: i32) -> (i32, i32) {
    %c2_i32 = arith.constant 2 : i32
    %0 = arith.muli %arg0, %c2_i32 : i32
    %1 = arith.addi %0, %arg1 : i32
    %c0_i32 = arith.constant 0 : i32
    %c0_i32_0 = arith.constant 0 : i32
    return %1, %c0_i32 : i32, i32
  }
}

</mosaic_0001>

<bundles_post_ra>
// kernel: conv2d_batchnorm_forward.4
= control target key start
LH: loop header
LB: loop body
LE: loop exit
PB: predicated region body
PF: predicated region fallthrough
CT: control target
= control target key end

     0   :  { %s655_s12 = smov 0   ;;  %s657_s13 = smov 0   ;;  %s788_s0 = inlined_call_operand.vmem [shape: bf16[512,16], index: 0, kind: input, shape index: {}]   ;;  %s789_s1 = inlined_call_operand.vmem [shape: f32[1,16], index: 1, kind: input, shape index: {}]   ;;  %s790_s2 = inlined_call_operand.vmem [shape: f32[1,16], index: 2, kind: input, shape index: {}]   ;;  %s791_s3 = inlined_call_operand.vmem [shape: f32[4,2,16], index: 3, kind: output, shape index: {}]  }
   0x1   :  { %s659_s14 = smov 0   ;;  %s661_s15 = smov 0  }
   0x2   :  { %s663_s16 = smov 0  }
   0x3 LB: > { %s22_s17 = sadd.s32 1, %s625_s14  ;;  %s25_s18 = sadd.s32 1, %s629_s15  ;;  %s633_s16 = sphi %s663_s16, %s13_s16   ;;  %s629_s15 = sphi %s661_s15, %s795_s15   ;;  %s625_s14 = sphi %s659_s14, %s794_s14   ;;  %s621_s13 = sphi %s657_s13, %s793_s13   ;;  %s617_s12 = sphi %s655_s12, %s792_s12  }
   0x4   : > { %p23_p0 = scmp.ge.s32.totalorder %s22_s17, 2  ;;  %p506_p1 = scmp.ge.s32.totalorder %s633_s16, 1 }
   0x5   : > { %p162_p2 = scmp.lt.s32.totalorder %s633_s16, 5 }
   0x6   : > { %s797_s17 = smov (%p23_p0, %s22_s17), 0  ;;  %s799_s18 = smov (!%p23_p0, %s25_s18), %s629_s15 }
   0x7   : > { %p163_p3 = pnand %p506_p1, %p162_p2  ;;  %p27_p4 = scmp.ge.s32.totalorder %s799_s18, 2 }
   0x8   : > { %s507_s19 = sshll.u32 (!%p163_p3), %s621_s13, 1  ;;  %v512_v6 = vld [vmem:[%s789_s1] ss:$0 sm:$0xff] (!%p163_p3)  ;;  %vm333_vm0 = vcmask (!%p163_p3), 130048  }
   0x9   : > { %s801_s18 = smov (%p27_p4, %s799_s18), 0  ;;  %166 = sbr.rel (%p163_p3) target bundleno = 87 (0x57), region = 32 }
   0xa   : > { %s685_s20 = sadd.s32 (!%p163_p3), %s617_s12, %s507_s19  ;;  %v697_v17 = vld [vmem:[%s790_s2] ss:$0 sm:$0xff] (!%p163_p3) }
   0xb   : > { %s508_s21 = sshll.u32 (!%p163_p3), %s685_s20, 4  ;;  %p201_p6 = scmp.lt.s32.totalorder (!%p163_p3), %s685_s20, 3 }
   0xc   : > { %p192_p5 = scmp.lt.s32.totalorder (!%p163_p3), %s508_s21, 63 }
  0x10   : > { %s803_s21 = smov (!%p192_p5, %s508_s21), 63  ;;  %s805_s20 = smov (!%p201_p6, %s685_s20), 3 }
  0x11   : > { %s509_s22 = sshll.u32 %s803_s21, 2  ;;  %s511_s30 = sshll.u32 %s805_s20, 1 }
  0x12   : > { %s195_s25 = scalar_lea.vmem %s788_s0, %s509_s22  ;;  %s204_s6 = scalar_lea.vmem %s791_s3, %s511_s30 }
  0x13   : > { %v517_v0 = vld [vmem:[%s195_s25] sm:$0xff]   ;;  %v548_v1 = vld [vmem:[%s195_s25 + $0x8] sm:$0xff]   ;;  %v549_v5 = vld [vmem:[%s195_s25 + $0x10] sm:$0xff]  }
  0x14   : > { %v518_v2 = vunpack.c.l.bf16 %v517_v0  ;;  %v519_v3 = vunpack.c.h.bf16 %v517_v0  ;;  %v522_v4 = vunpack.c.l.bf16 %v548_v1  ;;  %v523_v7 = vunpack.c.h.bf16 %v548_v1  ;;  %v550_v8 = vld [vmem:[%s195_s25 + $0x18] sm:$0xff]   ;;  %v551_v9 = vld [vmem:[%s195_s25 + $0x20] sm:$0xff]   ;;  %v552_v11 = vld [vmem:[%s195_s25 + $0x28] sm:$0xff]  }
  0x15   : > { %v526_v10 = vunpack.c.l.bf16 %v549_v5  ;;  %v553_v12 = vld [vmem:[%s195_s25 + $0x30] sm:$0xff]   ;;  %v527_v15 = vunpack.c.h.bf16 %v549_v5  ;;  %v530_v18 = vunpack.c.l.bf16 %v550_v8  ;;  %v531_v19 = vunpack.c.h.bf16 %v550_v8  ;;  %v554_v21 = vld [vmem:[%s195_s25 + $0x38] sm:$0xff]  }
  0x16   : > { %v246_v13 = vmul.f32 %v518_v2, %v512_v6  ;;  %v247_v14 = vmul.f32 %v519_v3, %v512_v6  ;;  %v248_v16 = vmul.f32 %v522_v4, %v512_v6  ;;  %v534_v20 = vunpack.c.l.bf16 %v551_v9 }
  0x17   : > { %v249_v22 = vmul.f32 %v523_v7, %v512_v6  ;;  %v535_v23 = vunpack.c.h.bf16 %v551_v9  ;;  %v538_v24 = vunpack.c.l.bf16 %v552_v11  ;;  %v539_v25 = vunpack.c.h.bf16 %v552_v11 }
  0x18   : > { %v542_v26 = vunpack.c.l.bf16 %v553_v12  ;;  %v543_v27 = vunpack.c.h.bf16 %v553_v12  ;;  %v250_v28 = vmul.f32 %v526_v10, %v512_v6  ;;  %v269_v29 = vadd.f32 %v697_v17, %v246_v13 }
  0x19   : > { %v270_v30 = vadd.f32 %v697_v17, %v247_v14  ;;  %v546_v31 = vunpack.c.l.bf16 %v554_v21  ;;  %v547_v32 = vunpack.c.h.bf16 %v554_v21  ;;  %v251_v33 = vmul.f32 %v527_v15, %v512_v6 }
  0x1a   : > { %v271_v34 = vadd.f32 %v697_v17, %v248_v16  ;;  %v252_v35 = vmul.f32 %v530_v18, %v512_v6  ;;  %v253_v36 = vmul.f32 %v531_v19, %v512_v6  ;;  %v254_v37 = vmul.f32 %v534_v20, %v512_v6 }
  0x1b   : > { %v272_v38 = vadd.f32 %v697_v17, %v249_v22  ;;  %v255_v39 = vmul.f32 %v535_v23, %v512_v6  ;;  %v256_v40 = vmul.f32 %v538_v24, %v512_v6  ;;  %v257_v41 = vmul.f32 %v539_v25, %v512_v6 }
  0x1c   : > { %v258_v42 = vmul.f32 %v542_v26, %v512_v6  ;;  %v259_v43 = vmul.f32 %v543_v27, %v512_v6  ;;  %v273_v44 = vadd.f32 %v697_v17, %v250_v28  ;;  %v301_v45 = vmul.f32 0.01, %v269_v29 }
  0x1d   : > { %v302_v46 = vmul.f32 0.01, %v270_v30  ;;  %v260_v47 = vmul.f32 %v546_v31, %v512_v6  ;;  %vm285_vm1 = vcmp.ge.f32.partialorder %v269_v29, 0.0  ;;  %vm286_vm2 = vcmp.ge.f32.partialorder %v270_v30, 0.0 }
  0x1e   : > { %v303_v48 = vmul.f32 0.01, %v271_v34  ;;  %v261_v49 = vmul.f32 %v547_v32, %v512_v6  ;;  %v274_v50 = vadd.f32 %v697_v17, %v251_v33  ;;  %vm287_vm3 = vcmp.ge.f32.partialorder %v271_v34, 0.0 }
  0x1f   : > { %v304_v51 = vmul.f32 0.01, %v272_v38  ;;  %v275_v52 = vadd.f32 %v697_v17, %v252_v35  ;;  %v276_v53 = vadd.f32 %v697_v17, %v253_v36  ;;  %v277_v54 = vadd.f32 %v697_v17, %v254_v37 }
  0x20   : > { %vm288_vm4 = vcmp.ge.f32.partialorder %v272_v38, 0.0  ;;  %v278_v55 = vadd.f32 %v697_v17, %v255_v39  ;;  %v305_v56 = vmul.f32 0.01, %v273_v44  ;;  %v317_v57 = vsel %vm285_vm1, %v269_v29, %v301_v45 }
  0x21   : > { %v318_v58 = vsel %vm286_vm2, %v270_v30, %v302_v46  ;;  %vm289_vm5 = vcmp.ge.f32.partialorder %v273_v44, 0.0  ;;  %v319_v59 = vsel %vm287_vm3, %v271_v34, %v303_v48  ;;  %v334_v60 = vsel %vm333_vm0, %v317_v57, 0.0 }
  0x22   : > { %v335_v61 = vsel %vm333_vm0, %v318_v58, 0.0  ;;  %v306_v62 = vmul.f32 0.01, %v274_v50  ;;  %v320_v63 = vsel %vm288_vm4, %v272_v38, %v304_v51  ;;  %v337_v1 = vsel %vm333_vm0, %v319_v59, 0.0 }
  0x23   : > { %v336_v0 = vadd.f32 %v335_v61, %v334_v60  ;;  %v279_v2 = vadd.f32 %v697_v17, %v256_v40  ;;  %v280_v3 = vadd.f32 %v697_v17, %v257_v41  ;;  %vm290_vm6 = vcmp.ge.f32.partialorder %v274_v50, 0.0 }
  0x24   : > { %v339_v4 = vsel %vm333_vm0, %v320_v63, 0.0  ;;  %v716_v5 = vadd.f32 %v697_v17, %v258_v42  ;;  %v307_v6 = vmul.f32 0.01, %v275_v52  ;;  %v321_v7 = vsel %vm289_vm5, %v273_v44, %v305_v56 }
  0x25   : > { %v338_v8 = vadd.f32 %v337_v1, %v336_v0  ;;  %v719_v9 = vadd.f32 %v697_v17, %v259_v43  ;;  %v722_v10 = vadd.f32 %v697_v17, %v260_v47  ;;  %vm291_vm7 = vcmp.ge.f32.partialorder %v275_v52, 0.0 }
  0x26   : > { %v341_v11 = vsel %vm333_vm0, %v321_v7, 0.0  ;;  %v308_v12 = vmul.f32 0.01, %v276_v53  ;;  %v322_v13 = vsel %vm290_vm6, %v274_v50, %v306_v62  ;;  %v373_v15 = vmul.f32 %v317_v57, %v317_v57 }
  0x27   : > { %v340_v14 = vadd.f32 %v339_v4, %v338_v8  ;;  %vm292_vm8 = vcmp.ge.f32.partialorder %v276_v53, 0.0  ;;  %v343_v16 = vsel %vm333_vm0, %v322_v13, 0.0  ;;  %v374_v18 = vmul.f32 %v318_v58, %v318_v58 }
  0x28   : > { %v375_v19 = vmul.f32 %v319_v59, %v319_v59  ;;  %v727_v20 = vadd.f32 %v697_v17, %v261_v49  ;;  %v309_v21 = vmul.f32 0.01, %v277_v54  ;;  %v323_v22 = vsel %vm291_vm7, %v275_v52, %v307_v6 }
  0x29   : > { %v342_v23 = vadd.f32 %v341_v11, %v340_v14  ;;  %vm293_vm9 = vcmp.ge.f32.partialorder %v277_v54, 0.0  ;;  %vm294_vm10 = vcmp.ge.f32.partialorder %v278_v55, 0.0  ;;  %v345_v24 = vsel %vm333_vm0, %v323_v22, 0.0 }
  0x2a   : > { %v376_v25 = vmul.f32 %v320_v63, %v320_v63  ;;  %v310_v26 = vmul.f32 0.01, %v278_v55  ;;  %v324_v27 = vsel %vm292_vm8, %v276_v53, %v308_v12  ;;  %v389_v29 = vsel %vm333_vm0, %v373_v15, 0.0 }
  0x2b   : > { %v344_v28 = vadd.f32 %v343_v16, %v342_v23  ;;  %v347_v30 = vsel %vm333_vm0, %v324_v27, 0.0  ;;  %v377_v31 = vmul.f32 %v321_v7, %v321_v7  ;;  %v390_v32 = vsel %vm333_vm0, %v374_v18, 0.0 }
  0x2c   : > { %v392_v17 = vsel %vm333_vm0, %v375_v19, 0.0  ;;  %v311_v33 = vmul.f32 0.01, %v279_v2  ;;  %v325_v34 = vsel %vm293_vm9, %v277_v54, %v309_v21  ;;  %v391_v36 = vadd.f32 %v390_v32, %v389_v29 }
  0x2d   : > { %v346_v35 = vadd.f32 %v345_v24, %v344_v28  ;;  %vm295_vm11 = vcmp.ge.f32.partialorder %v279_v2, 0.0  ;;  %v349_v37 = vsel %vm333_vm0, %v325_v34, 0.0  ;;  %v378_v38 = vmul.f32 %v322_v13, %v322_v13 }
  0x2e   : > { %v394_v39 = vsel %vm333_vm0, %v376_v25, 0.0  ;;  %v312_v40 = vmul.f32 0.01, %v280_v3  ;;  %v326_v41 = vsel %vm294_vm10, %v278_v55, %v310_v26  ;;  %v393_v43 = vadd.f32 %v392_v17, %v391_v36 }
  0x2f   : > { %v348_v42 = vadd.f32 %v347_v30, %v346_v35  ;;  %vm296_vm12 = vcmp.ge.f32.partialorder %v280_v3, 0.0  ;;  %v351_v44 = vsel %vm333_vm0, %v326_v41, 0.0  ;;  %v379_v45 = vmul.f32 %v323_v22, %v323_v22 }
  0x30   : > { %v396_v46 = vsel %vm333_vm0, %v377_v31, 0.0  ;;  %v313_v47 = vmul.f32 0.01, %v716_v5  ;;  %v327_v48 = vsel %vm295_vm11, %v279_v2, %v311_v33  ;;  %v395_v50 = vadd.f32 %v394_v39, %v393_v43 }
  0x31   : > { %v350_v49 = vadd.f32 %v349_v37, %v348_v42  ;;  %vm297_vm13 = vcmp.ge.f32.partialorder %v716_v5, 0.0  ;;  %v353_v51 = vsel %vm333_vm0, %v327_v48, 0.0  ;;  %v380_v52 = vmul.f32 %v324_v27, %v324_v27 }
  0x32   : > { %v398_v53 = vsel %vm333_vm0, %v378_v38, 0.0  ;;  %v314_v54 = vmul.f32 0.01, %v719_v9  ;;  %v328_v55 = vsel %vm296_vm12, %v280_v3, %v312_v40  ;;  %v397_v57 = vadd.f32 %v396_v46, %v395_v50 }
  0x33   : > { %v352_v56 = vadd.f32 %v351_v44, %v350_v49  ;;  %vm298_vm14 = vcmp.ge.f32.partialorder %v719_v9, 0.0  ;;  %v355_v58 = vsel %vm333_vm0, %v328_v55, 0.0  ;;  %v381_v59 = vmul.f32 %v325_v34, %v325_v34 }
  0x34   : > { %v400_v60 = vsel %vm333_vm0, %v379_v45, 0.0  ;;  %v315_v61 = vmul.f32 0.01, %v722_v10  ;;  %v329_v62 = vsel %vm297_vm13, %v716_v5, %v313_v47  ;;  %v399_v0 = vadd.f32 %v398_v53, %v397_v57 }
  0x35   : > { %v354_v63 = vadd.f32 %v353_v51, %v352_v56  ;;  %vm299_vm15 = vcmp.ge.f32.partialorder %v722_v10, 0.0  ;;  %v357_v1 = vsel %vm333_vm0, %v329_v62, 0.0  ;;  %v382_v2 = vmul.f32 %v326_v41, %v326_v41 }
  0x36   : > { %v402_v3 = vsel %vm333_vm0, %v380_v52, 0.0  ;;  %v316_v4 = vmul.f32 0.01, %v727_v20  ;;  %v330_v6 = vsel %vm298_vm14, %v719_v9, %v314_v54  ;;  %v401_v8 = vadd.f32 %v400_v60, %v399_v0 }
  0x37   : > { %v356_v7 = vadd.f32 %v355_v58, %v354_v63  ;;  %vm300_vm1 = vcmp.ge.f32.partialorder %v727_v20, 0.0  ;;  %v359_v11 = vsel %vm333_vm0, %v330_v6, 0.0  ;;  %v383_v5 = vmul.f32 %v327_v48, %v327_v48 }
  0x38   : > { %v404_v12 = vsel %vm333_vm0, %v381_v59, 0.0  ;;  %v331_v13 = vsel %vm299_vm15, %v722_v10, %v315_v61  ;;  %v403_v15 = vadd.f32 %v402_v3, %v401_v8  ;;  %v384_v18 = vmul.f32 %v328_v55, %v328_v55 }
  0x39   : > { %v358_v14 = vadd.f32 %v357_v1, %v356_v7  ;;  %v361_v16 = vsel %vm333_vm0, %v331_v13, 0.0  ;;  %v406_v19 = vsel %vm333_vm0, %v382_v2, 0.0  ;;  %v332_v9 = vsel %vm300_vm1, %v727_v20, %v316_v4 }
  0x3a   : > { %v405_v22 = vadd.f32 %v404_v12, %v403_v15  ;;  %v363_v23 = vsel %vm333_vm0, %v332_v9, 0.0  ;;  %v385_v24 = vmul.f32 %v329_v62, %v329_v62  ;;  %v408_v25 = vsel %vm333_vm0, %v383_v5, 0.0 }
  0x3b   : > { %v360_v21 = vadd.f32 %v359_v11, %v358_v14  ;;  %v386_v27 = vmul.f32 %v330_v6, %v330_v6  ;;  %v410_v28 = vsel %vm333_vm0, %v384_v18, 0.0  ;;  %v387_v31 = vmul.f32 %v331_v13, %v331_v13 }
  0x3c   : > { %v407_v10 = vadd.f32 %v406_v19, %v405_v22  ;;  %v412_v32 = vsel %vm333_vm0, %v385_v24, 0.0  ;;  %v388_v33 = vmul.f32 %v332_v9, %v332_v9  ;;  %vm371_vm2 = vcmask 122880  }
  0x3d   : > { %v362_v26 = vadd.f32 %v361_v16, %v360_v21  ;;  %v414_v34 = vsel %vm333_vm0, %v386_v27, 0.0  ;;  %v416_v37 = vsel %vm333_vm0, %v387_v31, 0.0 }
  0x3e   : > { %v409_v30 = vadd.f32 %v408_v25, %v407_v10  ;;  %v418_v40 = vsel %vm333_vm0, %v388_v33, 0.0 }
  0x3f   : > { %v364_v29 = vadd.f32 %v363_v23, %v362_v26 }
  0x40   : > { %v411_v17 = vadd.f32 %v410_v28, %v409_v30 }
  0x41   : > { %v365_v20 = vrot.slane %v364_v29, 4 }
  0x42   : > { %v413_v36 = vadd.f32 %v412_v32, %v411_v17 }
  0x43   : > { %v366_v35 = vadd.f32 %v365_v20, %v364_v29 }
  0x44   : > { %v415_v39 = vadd.f32 %v414_v34, %v413_v36 }
  0x45   : > { %v367_v38 = vrot.slane %v366_v35, 2 }
  0x46   : > { %v417_v42 = vadd.f32 %v416_v37, %v415_v39 }
  0x47   : > { %v368_v41 = vadd.f32 %v367_v38, %v366_v35 }
  0x48   : > { %v419_v44 = vadd.f32 %v418_v40, %v417_v42 }
  0x49   : > { %v369_v43 = vrot.slane %v368_v41, 1 }
  0x4a   : > { %v420_v46 = vrot.slane %v419_v44, 4 }
  0x4b   : > { %v370_v45 = vadd.f32 %v369_v43, %v368_v41 }
  0x4c   : > { %v421_v47 = vadd.f32 %v420_v46, %v419_v44 }
  0x4d   : > { %372 = vst.msk [vmem:[%s204_s6] sm:$0x1] %vm371_vm2, %v370_v45 }
  0x4e   : > { %v422_v48 = vrot.slane %v421_v47, 2 }
  0x50   : > { %v423_v49 = vadd.f32 %v422_v48, %v421_v47 }
  0x52   : > { %v424_v50 = vrot.slane %v423_v49, 1 }
  0x54   : > { %v425_v51 = vadd.f32 %v424_v50, %v423_v49 }
  0x56   : > { %426 = vst.msk [vmem:[%s204_s6 + $0x1] sm:$0x1] %vm371_vm2, %v425_v51 }
  0x57 PF: > { %s13_s16 = sadd.s32 1, %s633_s16   ;;  %s792_s12 = smov %s625_s14 }
  0x58   : > { %p10_p7 = scmp.ge.s32.totalorder %s13_s16, 6   ;;  %s793_s13 = smov %s629_s15 }
  0x59   : > { %s794_s14 = smov %s797_s17  ;;  %s795_s15 = smov %s801_s18 }
  0x5a   :  { %12 = sbr.rel (!%p10_p7) target bundleno = 3 (0x3), region = 62 }

// kernel: conv2d_batchnorm_forward.5
= control target key start
LH: loop header
LB: loop body
LE: loop exit
PB: predicated region body
PF: predicated region fallthrough
CT: control target
= control target key end

     0   :  { %s768_s18 = smov 0   ;;  %s770_s19 = smov 0   ;;  %s961_s0 = inlined_call_operand.vmem [shape: bf16[512,16], index: 0, kind: input, shape index: {}]   ;;  %s962_s1 = inlined_call_operand.vmem [shape: f32[1,16], index: 1, kind: input, shape index: {}]   ;;  %s963_s2 = inlined_call_operand.vmem [shape: f32[1,16], index: 2, kind: input, shape index: {}]   ;;  %s964_s3 = inlined_call_operand.vmem [shape: f32[2,1,16], index: 3, kind: input, shape index: {}]   ;;  %s965_s4 = inlined_call_operand.vmem [shape: f32[1,16], index: 4, kind: input, shape index: {}]   ;;  %s966_s5 = inlined_call_operand.vmem [shape: f32[512,16], index: 5, kind: output, shape index: {}]  }
   0x1   :  { %s772_s20 = smov 0   ;;  %s774_s21 = smov 0  }
   0x2   :  { %s776_s22 = smov 0  }
   0x3 LB: > { %s24_s23 = sadd.s32 1, %s728_s20  ;;  %s27_s24 = sadd.s32 1, %s732_s21  ;;  %s736_s22 = sphi %s776_s22, %s15_s22   ;;  %s732_s21 = sphi %s774_s21, %s970_s21   ;;  %s728_s20 = sphi %s772_s20, %s969_s20   ;;  %s724_s19 = sphi %s770_s19, %s968_s19   ;;  %s720_s18 = sphi %s768_s18, %s967_s18  }
   0x4   : > { %p25_p0 = scmp.ge.s32.totalorder %s24_s23, 2  ;;  %p606_p1 = scmp.ge.s32.totalorder %s736_s22, 1 }
   0x5   : > { %p220_p2 = scmp.lt.s32.totalorder %s736_s22, 5 }
   0x6   : > { %s972_s23 = smov (%p25_p0, %s24_s23), 0  ;;  %s974_s24 = smov (!%p25_p0, %s27_s24), %s732_s21 }
   0x7   : > { %p221_p3 = pnand %p606_p1, %p220_p2  ;;  %p29_p4 = scmp.ge.s32.totalorder %s974_s24, 2 }
   0x8   : > { %s607_s25 = sshll.u32 (!%p221_p3), %s724_s19, 1  ;;  %p265_p5 = scmp.lt.s32.totalorder (!%p221_p3), %s724_s19, 1  ;;  %v811_v0 = vld [vmem:[%s962_s1] ss:$0 sm:$0xff] (!%p221_p3)  ;;  %vm498_vm0 = vcmask (!%p221_p3), 130048  }
   0x9   : > { %s976_s24 = smov (%p29_p4, %s974_s24), 0  ;;  %224 = sbr.rel (%p221_p3) target bundleno = 72 (0x48), region = 40 }
   0xa   : > { %s256_s26 = sadd.s32 (!%p221_p3), %s720_s18, %s607_s25  ;;  %v820_v9 = vld [vmem:[%s963_s2] ss:$0 sm:$0xff] (!%p221_p3) }
   0xb   : > { %s608_s27 = sshll.u32 (!%p221_p3), %s256_s26, 4  ;;  %v849_v36 = vld [vmem:[%s965_s4] ss:$0 sm:$0xff] (!%p221_p3) }
   0xc   : > { %p258_p6 = scmp.lt.s32.totalorder (!%p221_p3), %s608_s27, 63 }
  0x10   : > { %s978_s27 = smov (!%p258_p6, %s608_s27), 63  ;;  %s980_s19 = smov (!%p265_p5, %s724_s19), 1 }
  0x11   : > { %s609_s28 = sshll.u32 %s978_s27, 2  ;;  %s267_s13 = scalar_lea.vmem %s964_s3, %s980_s19 }
  0x12   : > { %s806_s6 = scalar_lea.vmem %s961_s0, %s609_s28  ;;  %v838_v26 = vld [vmem:[%s267_s13] ss:$0 sm:$0xff]  ;;  %s612_s16 = sshll.u32 %s978_s27, 3 }
  0x13   : > { %v620_v1 = vld [vmem:[%s806_s6] sm:$0xff]   ;;  %v651_v2 = vld [vmem:[%s806_s6 + $0x8] sm:$0xff]   ;;  %v652_v3 = vld [vmem:[%s806_s6 + $0x10] sm:$0xff]   ;;  %s864_s19 = scalar_lea.vmem %s966_s5, %s612_s16 }
  0x14   : > { %v621_v4 = vunpack.c.l.bf16 %v620_v1  ;;  %v622_v5 = vunpack.c.h.bf16 %v620_v1  ;;  %v625_v6 = vunpack.c.l.bf16 %v651_v2  ;;  %v626_v7 = vunpack.c.h.bf16 %v651_v2  ;;  %v653_v8 = vld [vmem:[%s806_s6 + $0x18] sm:$0xff]   ;;  %v654_v61 = vld [vmem:[%s806_s6 + $0x20] sm:$0xff]  }
  0x15   : > { %v629_v10 = vunpack.c.l.bf16 %v652_v3  ;;  %v630_v11 = vunpack.c.h.bf16 %v652_v3  ;;  %v633_v12 = vunpack.c.l.bf16 %v653_v8  ;;  %v634_v13 = vunpack.c.h.bf16 %v653_v8  ;;  %v655_v3 = vld [vmem:[%s806_s6 + $0x28] sm:$0xff]  }
  0x16   : > { %v317_v14 = vmul.f32 %v621_v4, %v811_v0  ;;  %v318_v15 = vmul.f32 %v622_v5, %v811_v0  ;;  %v319_v16 = vmul.f32 %v625_v6, %v811_v0  ;;  %v320_v17 = vmul.f32 %v626_v7, %v811_v0 }
  0x17   : > { %v321_v18 = vmul.f32 %v629_v10, %v811_v0  ;;  %v322_v19 = vmul.f32 %v630_v11, %v811_v0  ;;  %v323_v20 = vmul.f32 %v633_v12, %v811_v0  ;;  %v324_v21 = vmul.f32 %v634_v13, %v811_v0 }
  0x18   : > { %v340_v22 = vadd.f32 %v820_v9, %v317_v14  ;;  %v341_v23 = vadd.f32 %v820_v9, %v318_v15  ;;  %v342_v24 = vadd.f32 %v820_v9, %v319_v16  ;;  %v343_v25 = vadd.f32 %v820_v9, %v320_v17 }
  0x19   : > { %v344_v27 = vadd.f32 %v820_v9, %v321_v18  ;;  %v345_v28 = vadd.f32 %v820_v9, %v322_v19  ;;  %v346_v29 = vadd.f32 %v820_v9, %v323_v20  ;;  %v844_v30 = vadd.f32 %v820_v9, %v324_v21  ;;  %v656_v18 = vld [vmem:[%s806_s6 + $0x30] sm:$0xff]  }
  0x1a   : > { %vm356_vm1 = vcmp.ge.f32.partialorder %v340_v22, 0.0  ;;  %v372_v31 = vmul.f32 0.01, %v340_v22  ;;  %vm357_vm2 = vcmp.ge.f32.partialorder %v341_v23, 0.0  ;;  %v373_v32 = vmul.f32 0.01, %v341_v23 }
  0x1b   : > { %vm358_vm3 = vcmp.ge.f32.partialorder %v342_v24, 0.0  ;;  %v374_v33 = vmul.f32 0.01, %v342_v24  ;;  %vm359_vm4 = vcmp.ge.f32.partialorder %v343_v25, 0.0  ;;  %v375_v34 = vmul.f32 0.01, %v343_v25 }
  0x1c   : > { %v388_v35 = vsel %vm356_vm1, %v340_v22, %v372_v31  ;;  %v389_v37 = vsel %vm357_vm2, %v341_v23, %v373_v32  ;;  %vm360_vm5 = vcmp.ge.f32.partialorder %v344_v27, 0.0  ;;  %v376_v38 = vmul.f32 0.01, %v344_v27 }
  0x1d   : > { %v411_v39 = vmul.f32 %v838_v26, %v388_v35  ;;  %v412_v40 = vmul.f32 %v838_v26, %v389_v37  ;;  %v390_v41 = vsel %vm358_vm3, %v342_v24, %v374_v33  ;;  %v391_v42 = vsel %vm359_vm4, %v343_v25, %v375_v34 }
  0x1e   : > { %v413_v43 = vmul.f32 %v838_v26, %v390_v41  ;;  %v414_v44 = vmul.f32 %v838_v26, %v391_v42  ;;  %v392_v45 = vsel %vm360_vm5, %v344_v27, %v376_v38  ;;  %vm361_vm6 = vcmp.ge.f32.partialorder %v345_v28, 0.0 }
  0x1f   : > { %v434_v46 = vadd.f32 %v849_v36, %v411_v39  ;;  %v435_v47 = vadd.f32 %v849_v36, %v412_v40  ;;  %v415_v48 = vmul.f32 %v838_v26, %v392_v45  ;;  %v377_v49 = vmul.f32 0.01, %v345_v28  ;;  %v657_v39 = vld [vmem:[%s806_s6 + $0x38] sm:$0xff]  }
  0x20   : > { %v436_v50 = vadd.f32 %v849_v36, %v413_v43  ;;  %v437_v51 = vadd.f32 %v849_v36, %v414_v44  ;;  %vm362_vm7 = vcmp.ge.f32.partialorder %v346_v29, 0.0  ;;  %v378_v52 = vmul.f32 0.01, %v346_v29 }
  0x21   : > { %vm450_vm8 = vcmp.ge.f32.partialorder %v434_v46, 0.0  ;;  %v466_v53 = vmul.f32 0.01, %v434_v46  ;;  %vm451_vm9 = vcmp.ge.f32.partialorder %v435_v47, 0.0  ;;  %v467_v54 = vmul.f32 0.01, %v435_v47 }
  0x22   : > { %vm452_vm10 = vcmp.ge.f32.partialorder %v436_v50, 0.0  ;;  %v468_v55 = vmul.f32 0.01, %v436_v50  ;;  %vm453_vm11 = vcmp.ge.f32.partialorder %v437_v51, 0.0  ;;  %v469_v56 = vmul.f32 0.01, %v437_v51 }
  0x23   : > { %v482_v57 = vsel %vm450_vm8, %v434_v46, %v466_v53  ;;  %v483_v58 = vsel %vm451_vm9, %v435_v47, %v467_v54  ;;  %v438_v59 = vadd.f32 %v849_v36, %v415_v48  ;;  %v393_v60 = vsel %vm361_vm6, %v345_v28, %v377_v49 }
  0x24   : > { %499 = vst.msk [vmem:[%s864_s19] sm:$0xff] %vm498_vm0, %v482_v57  ;;  %500 = vst.msk [vmem:[%s864_s19 + $0x8] sm:$0xff] %vm498_vm0, %v483_v58  ;;  %v484_v62 = vsel %vm452_vm10, %v436_v50, %v468_v55  ;;  %v485_v63 = vsel %vm453_vm11, %v437_v51, %v469_v56  ;;  %v416_v1 = vmul.f32 %v838_v26, %v393_v60  ;;  %vm363_vm13 = vcmp.ge.f32.partialorder %v844_v30, 0.0 }
  0x25   : > { %v394_v2 = vsel %vm362_vm7, %v346_v29, %v378_v52  ;;  %501 = vst.msk [vmem:[%s864_s19 + $0x10] sm:$0xff] %vm498_vm0, %v484_v62  ;;  %502 = vst.msk [vmem:[%s864_s19 + $0x18] sm:$0xff] %vm498_vm0, %v485_v63  ;;  %vm454_vm12 = vcmp.ge.f32.partialorder %v438_v59, 0.0  ;;  %v470_v4 = vmul.f32 0.01, %v438_v59  ;;  %v637_v8 = vunpack.c.l.bf16 %v654_v61 }
  0x26   : > { %v417_v5 = vmul.f32 %v838_v26, %v394_v2  ;;  %v439_v6 = vadd.f32 %v849_v36, %v416_v1  ;;  %v379_v7 = vmul.f32 0.01, %v844_v30  ;;  %v638_v10 = vunpack.c.h.bf16 %v654_v61 }
  0x27   : > { %v486_v11 = vsel %vm454_vm12, %v438_v59, %v470_v4  ;;  %v641_v13 = vunpack.c.l.bf16 %v655_v3  ;;  %v642_v14 = vunpack.c.h.bf16 %v655_v3  ;;  %v325_v17 = vmul.f32 %v637_v8, %v811_v0 }
  0x28   : > { %v440_v12 = vadd.f32 %v849_v36, %v417_v5  ;;  %503 = vst.msk [vmem:[%s864_s19 + $0x20] sm:$0xff] %vm498_vm0, %v486_v11  ;;  %vm455_vm14 = vcmp.ge.f32.partialorder %v439_v6, 0.0  ;;  %v471_v15 = vmul.f32 0.01, %v439_v6  ;;  %v395_v16 = vsel %vm363_vm13, %v844_v30, %v379_v7 }
  0x29   : > { %v418_v20 = vmul.f32 %v838_v26, %v395_v16  ;;  %v326_v21 = vmul.f32 %v638_v10, %v811_v0  ;;  %v348_v23 = vadd.f32 %v820_v9, %v325_v17  ;;  %v327_v24 = vmul.f32 %v641_v13, %v811_v0 }
  0x2a   : > { %vm456_vm15 = vcmp.ge.f32.partialorder %v440_v12, 0.0  ;;  %v472_v19 = vmul.f32 0.01, %v440_v12  ;;  %v487_v22 = vsel %vm455_vm14, %v439_v6, %v471_v15  ;;  %v328_v25 = vmul.f32 %v642_v14, %v811_v0 }
  0x2b   : > { %504 = vst.msk [vmem:[%s864_s19 + $0x28] sm:$0xff] %vm498_vm0, %v487_v22  ;;  %v441_v28 = vadd.f32 %v849_v36, %v418_v20  ;;  %v349_v29 = vadd.f32 %v820_v9, %v326_v21  ;;  %v645_v30 = vunpack.c.l.bf16 %v656_v18  ;;  %vm364_vm1 = vcmp.ge.f32.partialorder %v348_v23, 0.0 }
  0x2c   : > { %v488_v27 = vsel %vm456_vm15, %v440_v12, %v472_v19  ;;  %v380_v31 = vmul.f32 0.01, %v348_v23  ;;  %v350_v32 = vadd.f32 %v820_v9, %v327_v24  ;;  %v351_v33 = vadd.f32 %v820_v9, %v328_v25 }
  0x2d   : > { %505 = vst.msk [vmem:[%s864_s19 + $0x30] sm:$0xff] %vm498_vm0, %v488_v27  ;;  %vm457_vm2 = vcmp.ge.f32.partialorder %v441_v28, 0.0  ;;  %v473_v34 = vmul.f32 0.01, %v441_v28  ;;  %vm365_vm3 = vcmp.ge.f32.partialorder %v349_v29, 0.0  ;;  %v329_v46 = vmul.f32 %v645_v30, %v811_v0 }
  0x2e   : > { %v381_v35 = vmul.f32 0.01, %v349_v29  ;;  %v396_v37 = vsel %vm364_vm1, %v348_v23, %v380_v31  ;;  %vm366_vm4 = vcmp.ge.f32.partialorder %v350_v32, 0.0  ;;  %v382_v38 = vmul.f32 0.01, %v350_v32 }
  0x2f   : > { %vm367_vm5 = vcmp.ge.f32.partialorder %v351_v33, 0.0  ;;  %v489_v40 = vsel %vm457_vm2, %v441_v28, %v473_v34  ;;  %v419_v41 = vmul.f32 %v838_v26, %v396_v37  ;;  %v383_v43 = vmul.f32 0.01, %v351_v33 }
  0x30   : > { %v397_v42 = vsel %vm365_vm3, %v349_v29, %v381_v35  ;;  %506 = vst.msk [vmem:[%s864_s19 + $0x38] sm:$0xff] %vm498_vm0, %v489_v40  ;;  %v398_v45 = vsel %vm366_vm4, %v350_v32, %v382_v38  ;;  %v646_v47 = vunpack.c.h.bf16 %v656_v18  ;;  %v649_v51 = vunpack.c.l.bf16 %v657_v39 }
  0x31   : > { %v420_v44 = vmul.f32 %v838_v26, %v397_v42  ;;  %v442_v48 = vadd.f32 %v849_v36, %v419_v41  ;;  %v421_v49 = vmul.f32 %v838_v26, %v398_v45  ;;  %v399_v50 = vsel %vm367_vm5, %v351_v33, %v383_v43 }
  0x32   : > { %v422_v53 = vmul.f32 %v838_v26, %v399_v50  ;;  %v352_v54 = vadd.f32 %v820_v9, %v329_v46  ;;  %v330_v55 = vmul.f32 %v646_v47, %v811_v0  ;;  %v331_v58 = vmul.f32 %v649_v51, %v811_v0 }
  0x33   : > { %v443_v52 = vadd.f32 %v849_v36, %v420_v44  ;;  %vm458_vm6 = vcmp.ge.f32.partialorder %v442_v48, 0.0  ;;  %v474_v56 = vmul.f32 0.01, %v442_v48  ;;  %v444_v57 = vadd.f32 %v849_v36, %v421_v49 }
  0x34   : > { %v445_v60 = vadd.f32 %v849_v36, %v422_v53  ;;  %vm368_vm8 = vcmp.ge.f32.partialorder %v352_v54, 0.0  ;;  %v384_v63 = vmul.f32 0.01, %v352_v54  ;;  %v353_v3 = vadd.f32 %v820_v9, %v330_v55 }
  0x35   : > { %vm459_vm7 = vcmp.ge.f32.partialorder %v443_v52, 0.0  ;;  %v475_v59 = vmul.f32 0.01, %v443_v52  ;;  %v490_v61 = vsel %vm458_vm6, %v442_v48, %v474_v56  ;;  %vm460_vm9 = vcmp.ge.f32.partialorder %v444_v57, 0.0 }
  0x36   : > { %v476_v62 = vmul.f32 0.01, %v444_v57  ;;  %507 = vst.msk [vmem:[%s864_s19 + $0x40] sm:$0xff] %vm498_vm0, %v490_v61  ;;  %vm461_vm10 = vcmp.ge.f32.partialorder %v445_v60, 0.0  ;;  %v477_v2 = vmul.f32 0.01, %v445_v60  ;;  %v400_v5 = vsel %vm368_vm8, %v352_v54, %v384_v63 }
  0x37   : > { %v491_v1 = vsel %vm459_vm7, %v443_v52, %v475_v59  ;;  %v354_v6 = vadd.f32 %v820_v9, %v331_v58  ;;  %v650_v7 = vunpack.c.h.bf16 %v657_v39  ;;  %v423_v10 = vmul.f32 %v838_v26, %v400_v5 }
  0x38   : > { %508 = vst.msk [vmem:[%s864_s19 + $0x48] sm:$0xff] %vm498_vm0, %v491_v1  ;;  %v492_v4 = vsel %vm460_vm9, %v444_v57, %v476_v62  ;;  %v493_v8 = vsel %vm461_vm10, %v445_v60, %v477_v2  ;;  %vm369_vm11 = vcmp.ge.f32.partialorder %v353_v3, 0.0  ;;  %v385_v11 = vmul.f32 0.01, %v353_v3 }
  0x39   : > { %509 = vst.msk [vmem:[%s864_s19 + $0x50] sm:$0xff] %vm498_vm0, %v492_v4  ;;  %510 = vst.msk [vmem:[%s864_s19 + $0x58] sm:$0xff] %vm498_vm0, %v493_v8  ;;  %vm370_vm12 = vcmp.ge.f32.partialorder %v354_v6, 0.0  ;;  %v386_v12 = vmul.f32 0.01, %v354_v6  ;;  %v332_v13 = vmul.f32 %v650_v7, %v811_v0  ;;  %v446_v14 = vadd.f32 %v849_v36, %v423_v10 }
  0x3a   : > { %v401_v15 = vsel %vm369_vm11, %v353_v3, %v385_v11 }
  0x3b   : > { %v424_v16 = vmul.f32 %v838_v26, %v401_v15  ;;  %v402_v17 = vsel %vm370_vm12, %v354_v6, %v386_v12  ;;  %v355_v18 = vadd.f32 %v820_v9, %v332_v13  ;;  %vm462_vm13 = vcmp.ge.f32.partialorder %v446_v14, 0.0 }
  0x3c   : > { %v478_v19 = vmul.f32 0.01, %v446_v14  ;;  %v425_v20 = vmul.f32 %v838_v26, %v402_v17 }
  0x3d   : > { %v447_v21 = vadd.f32 %v849_v36, %v424_v16  ;;  %vm371_vm14 = vcmp.ge.f32.partialorder %v355_v18, 0.0  ;;  %v387_v22 = vmul.f32 0.01, %v355_v18 }
  0x3e   : > { %v494_v23 = vsel %vm462_vm13, %v446_v14, %v478_v19  ;;  %v448_v0 = vadd.f32 %v849_v36, %v425_v20 }
  0x3f   : > { %511 = vst.msk [vmem:[%s864_s19 + $0x60] sm:$0xff] %vm498_vm0, %v494_v23  ;;  %vm463_vm15 = vcmp.ge.f32.partialorder %v447_v21, 0.0  ;;  %v479_v24 = vmul.f32 0.01, %v447_v21  ;;  %v403_v25 = vsel %vm371_vm14, %v355_v18, %v387_v22 }
  0x40   : > { %vm464_vm1 = vcmp.ge.f32.partialorder %v448_v0, 0.0  ;;  %v480_v9 = vmul.f32 0.01, %v448_v0  ;;  %v426_v27 = vmul.f32 %v838_v26, %v403_v25 }
  0x41   : > { %v495_v28 = vsel %vm463_vm15, %v447_v21, %v479_v24 }
  0x42   : > { %512 = vst.msk [vmem:[%s864_s19 + $0x68] sm:$0xff] %vm498_vm0, %v495_v28  ;;  %v496_v29 = vsel %vm464_vm1, %v448_v0, %v480_v9  ;;  %v449_v30 = vadd.f32 %v849_v36, %v426_v27 }
  0x43   : > { %513 = vst.msk [vmem:[%s864_s19 + $0x70] sm:$0xff] %vm498_vm0, %v496_v29 }
  0x44   : > { %vm465_vm2 = vcmp.ge.f32.partialorder %v449_v30, 0.0  ;;  %v481_v31 = vmul.f32 0.01, %v449_v30 }
  0x46   : > { %v497_v32 = vsel %vm465_vm2, %v449_v30, %v481_v31 }
  0x47   : > { %514 = vst.msk [vmem:[%s864_s19 + $0x78] sm:$0xff] %vm498_vm0, %v497_v32 }
  0x48 PF: > { %s15_s22 = sadd.s32 1, %s736_s22   ;;  %s967_s18 = smov %s728_s20 }
  0x49   : > { %p12_p7 = scmp.ge.s32.totalorder %s15_s22, 6   ;;  %s968_s19 = smov %s732_s21 }
  0x4a   : > { %s969_s20 = smov %s972_s23  ;;  %s970_s21 = smov %s976_s24 }
  0x4b   :  { %14 = sbr.rel (!%p12_p7) target bundleno = 3 (0x3), region = 73 }

// kernel: conv2d_batchnorm_forward.3
= control target key start
LH: loop header
LB: loop body
LE: loop exit
PB: predicated region body
PF: predicated region fallthrough
CT: control target
= control target key end

     0   :  { %s2643_s15 = smov 0   ;;  %s2645_s16 = smov 0   ;;  %s3128_s0 = inlined_call_operand.vmem [shape: bf16[4,10,18,4], index: 0, kind: input, shape index: {}]   ;;  %s3129_s1 = inlined_call_operand.vmem [shape: bf16[36,16], index: 1, kind: input, shape index: {}]   ;;  %s3130_s2 = inlined_call_operand.vmem [shape: f32[1,16], index: 2, kind: input, shape index: {}]   ;;  %s3131_s3 = inlined_call_operand.vmem [shape: bf16[512,16], index: 3, kind: output, shape index: {0}]   ;;  %s3132_s4 = inlined_call_operand.vmem [shape: f32[4,2,16], index: 4, kind: output, shape index: {1}]  }
   0x1   :  { %s2647_s17 = smov 0   ;;  %s2649_s18 = smov 0  }
   0x2   :  { %s2651_s19 = smov 0  }
   0x3 LB: > { %s24_s20 = sadd.s32 1, %s2600_s17  ;;  %s27_s21 = sadd.s32 1, %s2604_s18  ;;  %s2608_s19 = sphi %s2651_s19, %s15_s19   ;;  %s2604_s18 = sphi %s2649_s18, %s3136_s18   ;;  %s2600_s17 = sphi %s2647_s17, %s3135_s17   ;;  %s2596_s16 = sphi %s2645_s16, %s3134_s16   ;;  %s2592_s15 = sphi %s2643_s15, %s3133_s15  }
   0x4   : > { %p25_p0 = scmp.ge.s32.totalorder %s24_s20, 2  ;;  %p2055_p1 = scmp.ge.s32.totalorder %s2608_s19, 1 }
   0x5   : > { %p193_p2 = scmp.lt.s32.totalorder %s2608_s19, 5 }
   0x6   : > { %s3138_s20 = smov (%p25_p0, %s24_s20), 0  ;;  %s3140_s21 = smov (!%p25_p0, %s27_s21), %s2604_s18 }
   0x7   : > { %p194_p3 = pnand %p2055_p1, %p193_p2  ;;  %p29_p4 = scmp.ge.s32.totalorder %s3140_s21, 2 }
   0x8   : > { %s2056_s22 = sshll.u32 (!%p194_p3), %s2596_s16, 1  ;;  %vm636_vm0 = vcmask (!%p194_p3), 1046528   ;;  %s2610_s29 = smov (!%p194_p3), 12   ;;  %vm418_vm1 = vsmask.f32 (!%p194_p3), 7424  ;;  %vm321_vm2 = vcmask (!%p194_p3), 31744  }
   0x9   : > { %s3142_s21 = smov (%p29_p4, %s3140_s21), 0  ;;  %197 = sbr.rel (%p194_p3) target bundleno = 511 (0x1ff), region = 32 }
   0xa   : > { %s2673_s23 = sadd.s32 (!%p194_p3), %s2592_s15, %s2056_s22  ;;  %s2611_s30 = smov (!%p194_p3), 20   ;;  %vm539_vm3 = vcmask (!%p194_p3), 64544   ;;  %vm685_vm4 = vcmask (!%p194_p3), 97344   ;;  %vm775_vm5 = vcmask (!%p194_p3), 130144   ;;  %vm1658_vm6 = vcmask (!%p194_p3), 1041408  }
   0xb   : > { %p231_p5 = scmp.lt.s32.totalorder (!%p194_p3), %s2673_s23, 3  ;;  %s2612_s5 = smov (!%p194_p3), 8   ;;  %vm992_vm7 = vcmask (!%p194_p3), 162944   ;;  %vm1137_vm8 = vcmask (!%p194_p3), 195744   ;;  %vm1227_vm9 = vcmask (!%p194_p3), 228544   ;;  %vm1444_vm10 = vcmask (!%p194_p3), 261344  }
   0xc   : > { %s2613_s6 = smov (!%p194_p3), 4   ;;  %s2614_s7 = smov (!%p194_p3), 16   ;;  %vm1589_vm11 = vcmask (!%p194_p3), 294144   ;;  %vm1633_vm12 = vcmask (!%p194_p3), 293888   ;;  %vm1917_vm13 = vcmask (!%p194_p3), 125952   ;;  %vm1759_vm14 = vcmask (!%p194_p3), 130048  }
   0xd   : > { %s2615_s8 = smov (!%p194_p3), 24   ;;  %s2616_s9 = smov (!%p194_p3), 28   ;;  %vm1797_vm15 = vcmask (!%p194_p3), 122880  }
   0xe   : > { %s2617_s10 = smov (!%p194_p3), 32   ;;  %s2059_s22 = sshll.u32 (!%p194_p3), %s2673_s23, 4 }
   0xf   : > { %p241_p6 = scmp.lt.s32.totalorder (!%p194_p3), %s2059_s22, 63 }
  0x10   : > { %s2677_s24 = scalar_select %p231_p5, %s2673_s23, 3 }
  0x11   : > { %s3144_s22 = smov (!%p241_p6, %s2059_s22), 63 }
  0x12   : > { %s2398_s25 = smul.u32 120, %s2677_s24  ;;  %s2060_s27 = sshll.u32 %s3144_s22, 2 }
  0x13   : > { %s2062_s23 = sshll.u32 %s2677_s24, 1 }
  0x14   : > { %s2683_s28 = scalar_lea.vmem %s3128_s0, %s2398_s25 }
  0x15   : > { %v2447_v0 = vld [vmem:[%s2683_s28 + $0x18] sm:$0xff]   ;;  %v2448_v1 = vld [vmem:[%s2683_s28 + $0xc] sm:$0xff]   ;;  %v2450_v3 = vld [vmem:[%s2683_s28 + $0x14] ss:$0 sps:$4 sm:$0x11]  }
  0x16   : > { %753 = vrot.lane.b32.xlu1 %v2447_v0, %s2610_s29  ;;  %751 = vrot.lane.b32.xlu0 %v2448_v1, %s2610_s29  ;;  %v2449_v2 = vld [vmem:[%s2683_s28 + $0xc] sm:$0xfe]   ;;  %v2455_v4 = vld [vmem:[%s2683_s28] sm:$0xff]   ;;  %v1090_v6 = vrot.slane %v2450_v3, 1 }
  0x17   : > { %v1089_v5 = vrot.slane %v2449_v2, 1  ;;  %v2451_v7 = vld [vmem:[%s2683_s28] sm:$0xfe]   ;;  %v2452_v8 = vld [vmem:[%s2683_s28 + $0x8] ss:$0 sps:$4 sm:$0x11]  }
  0x18   : > { %v420_v9 = vshrl.u32 %v2455_v4, 16  ;;  %v637_v11 = vrot.slane %v2451_v7, 1  ;;  %v2453_v12 = vld [vmem:[%s2683_s28 + $0xc] sm:$0xfe]   ;;  %v422_v13 = vshll.u32 %v2455_v4, 16  ;;  %v638_v14 = vrot.slane %v2452_v8, 1 }
  0x19   : > { %v1091_v10 = vsel %vm636_vm0, %v1089_v5, %v1090_v6  ;;  %v2454_v15 = vld [vmem:[%s2683_s28 + $0x14] ss:$0 sps:$4 sm:$0x11]   ;;  %v640_v16 = vrot.slane %v2453_v12, 1  ;;  %v2457_v21 = vld [vmem:[%s2683_s28 + $0x18] sm:$0xfe]  }
  0x1a   : > { %1113 = vrot.lane.b32.xlu0 %v1091_v10, %s2611_s30  ;;  %v424_v17 = vrot.slane %v422_v13, 1  ;;  %v639_v18 = vsel %vm636_vm0, %v637_v11, %v638_v14  ;;  %v641_v19 = vrot.slane %v2454_v15, 1  ;;  %v2456_v20 = vld [vmem:[%s2683_s28 + $0x8] ss:$0 sps:$4 sm:$0x11]   ;;  %v1092_v26 = vrot.slane %v2457_v21, 1 }
  0x1b   : > { %661 = vrot.lane.b32.xlu1 %v639_v18, %s2612_s5  ;;  %v427_v24 = vshll.u32 %v2456_v20, 16  ;;  %v2458_v25 = vld [vmem:[%s2683_s28 + $0x20] ss:$0 sps:$4 sm:$0x11]   ;;  %v2459_v27 = vld [vmem:[%s2683_s28 + $0xc] sm:$0xff]   ;;  %v2461_v31 = vld [vmem:[%s2683_s28 + $0x18] sm:$0xff]  }
  0x1c   : > { %v642_v22 = vsel %vm636_vm0, %v640_v16, %v641_v19  ;;  %v425_v23 = vor.u32 %v424_v17, %v420_v9  ;;  %v1093_v29 = vrot.slane %v2458_v25, 1  ;;  %v2460_v30 = vld [vmem:[%s2683_s28 + $0x14] ss:$0 sps:$4 sm:$0x11]   ;;  %v432_v32 = vshrl.u32 %v2459_v27, 16  ;;  %v2463_v41 = vld [vmem:[%s2683_s28 + $0xc] sm:$0xff]  }
  0x1d   : > { %v429_v28 = vrot.slane %v427_v24, 1  ;;  %v434_v33 = vshll.u32 %v2459_v27, 16  ;;  %v439_v36 = vshll.u32 %v2460_v30, 16  ;;  %v2462_v37 = vld [vmem:[%s2683_s28 + $0x20] ss:$0 sps:$4 sm:$0x11]  }
  0x1e   : > { %v1094_v35 = vsel %vm636_vm0, %v1092_v26, %v1093_v29  ;;  %v885_v39 = vshrl.u32 %v2461_v31, 16  ;;  %v887_v40 = vshll.u32 %v2461_v31, 16  ;;  %v892_v43 = vshll.u32 %v2462_v37, 16  ;;  %v2464_v46 = vld [vmem:[%s2683_s28 + $0x14] ss:$0 sps:$4 sm:$0x11]  }
  0x1f   : > { %663 = vrot.lane.b32.xlu1 %v642_v22, %s2612_s5  ;;  %v430_v34 = vsel %vm418_vm1, %v425_v23, %v429_v28  ;;  %v436_v38 = vrot.slane %v434_v33, 1  ;;  %v441_v42 = vrot.slane %v439_v36, 1  ;;  %v873_v47 = vshrl.u32 %v2463_v41, 16  ;;  %v2466_v54 = vld [vmem:[%s2683_s28 + $0x24] sm:$0xff]   ;;  %v2467_v58 = vld [vmem:[%s2683_s28 + $0x18] sm:$0xff]  }
  0x20   : > { %515 = vrot.lane.b32.xlu0 %v430_v34, %s2613_s6  ;;  %v889_v45 = vrot.slane %v887_v40, 1  ;;  %v875_v48 = vshll.u32 %v2463_v41, 16  ;;  %v894_v49 = vrot.slane %v892_v43, 1  ;;  %v880_v53 = vshll.u32 %v2464_v46, 16  ;;  %v2465_v59 = vld [vmem:[%s2683_s28 + $0x18] sm:$0xff]   ;;  %v2469_v61 = vld [vmem:[%s2683_s28 + $0x24] sm:$0xff]  }
  0x21   : > { %v437_v44 = vor.u32 %v436_v38, %v432_v32  ;;  %v2468_v60 = vld [vmem:[%s2683_s28 + $0x20] ss:$0 sps:$4 sm:$0x11]   ;;  %v1325_v63 = vshrl.u32 %v2467_v58, 16  ;;  %v1327_v0 = vshll.u32 %v2467_v58, 16  ;;  %v1337_v3 = vshrl.u32 %v2469_v61, 16 }
  0x22   : > { %v890_v51 = vor.u32 %v889_v45, %v885_v39  ;;  %v877_v52 = vrot.slane %v875_v48, 1  ;;  %v882_v57 = vrot.slane %v880_v53, 1  ;;  %v1332_v1 = vshll.u32 %v2468_v60, 16  ;;  %v2470_v2 = vld [vmem:[%s2683_s28 + $0x2c] ss:$0 sps:$4 sm:$0x11]  }
  0x23   : > { %1115 = vrot.lane.b32.xlu1 %v1094_v35, %s2611_s30  ;;  %v442_v50 = vsel %vm418_vm1, %v437_v44, %v441_v42  ;;  %v1339_v4 = vshll.u32 %v2469_v61, 16  ;;  %v1329_v5 = vrot.slane %v1327_v0, 1  ;;  %v2473_v6 = vld [vmem:[%s2683_s28 + $0x18] sm:$0xff]   ;;  %v1344_v9 = vshll.u32 %v2470_v2, 16  ;;  %v2477_v11 = vld [vmem:[%s2683_s28 + $0x24] sm:$0xff]   ;;  %v2484_v58 = vld [vmem:[%s2683_s28 + $0x30] sm:$0xff]  }
  0x24   : > { %517 = vrot.lane.b32.xlu0 %v442_v50, %s2613_s6  ;;  %v895_v55 = vsel %vm418_vm1, %v890_v51, %v894_v49  ;;  %v878_v56 = vor.u32 %v877_v52, %v873_v47  ;;  %v1334_v7 = vrot.slane %v1332_v1, 1  ;;  %v2471_v10 = vld [vmem:[%s2683_s28 + $0x18] sm:$0xfe]   ;;  %v2472_v13 = vld [vmem:[%s2683_s28 + $0x20] ss:$0 sps:$4 sm:$0x11]  }
  0x25   : > { %v1341_v8 = vrot.slane %v1339_v4, 1  ;;  %v1330_v12 = vor.u32 %v1329_v5, %v1325_v63  ;;  %v444_v14 = vshrl.u32 %v2473_v6, 16  ;;  %v1346_v16 = vrot.slane %v1344_v9, 1  ;;  %v2474_v20 = vld [vmem:[%s2683_s28 + $0x20] ss:$0 sps:$4 sm:$0x11]  }
  0x26   : > { %v883_v62 = vsel %vm418_vm1, %v878_v56, %v882_v57  ;;  %v1541_v17 = vrot.slane %v2471_v10, 1  ;;  %v1542_v19 = vrot.slane %v2472_v13, 1  ;;  %v446_v21 = vshll.u32 %v2473_v6, 16  ;;  %v2475_v26 = vld [vmem:[%s2683_s28 + $0x24] sm:$0xfe]   ;;  %v2487_v50 = vld [vmem:[%s2683_s28 + $0x30] sm:$0xff]  }
  0x27   : > { %970 = vrot.lane.b32.xlu1 %v895_v55, %s2614_s7  ;;  %v1342_v15 = vor.u32 %v1341_v8, %v1337_v3  ;;  %v1335_v18 = vsel %vm418_vm1, %v1330_v12, %v1334_v7  ;;  %v456_v22 = vshrl.u32 %v2477_v11, 16  ;;  %v451_v25 = vshll.u32 %v2474_v20, 16  ;;  %v2476_v27 = vld [vmem:[%s2683_s28 + $0x2c] ss:$0 sps:$4 sm:$0x11]   ;;  %v2485_v47 = vld [vmem:[%s2683_s28 + $0x24] sm:$0xff]  }
  0x28   : > { %968 = vrot.lane.b32.xlu0 %v883_v62, %s2614_s7  ;;  %v448_v24 = vrot.slane %v446_v21, 1  ;;  %v458_v28 = vshll.u32 %v2477_v11, 16  ;;  %v1543_v29 = vsel %vm636_vm0, %v1541_v17, %v1542_v19  ;;  %v1544_v32 = vrot.slane %v2475_v26, 1  ;;  %v2478_v34 = vld [vmem:[%s2683_s28 + $0x2c] ss:$0 sps:$4 sm:$0x11]  }
  0x29   : > { %v1347_v23 = vsel %vm418_vm1, %v1342_v15, %v1346_v16  ;;  %v453_v31 = vrot.slane %v451_v25, 1  ;;  %v1545_v33 = vrot.slane %v2476_v27, 1  ;;  %v2479_v37 = vld [vmem:[%s2683_s28 + $0x18] sm:$0xfe]   ;;  %v463_v39 = vshll.u32 %v2478_v34, 16  ;;  %v2495_v16 = vld [vmem:[%s2683_s28 + $0x30] sm:$0xff]  }
  0x2a   : > { %v449_v30 = vor.u32 %v448_v24, %v444_v14  ;;  %v460_v35 = vrot.slane %v458_v28, 1  ;;  %v2480_v40 = vld [vmem:[%s2683_s28 + $0x20] ss:$0 sps:$4 sm:$0x11]   ;;  %v643_v42 = vrot.slane %v2479_v37, 1  ;;  %v897_v53 = vshrl.u32 %v2485_v47, 16 }
  0x2b   : > { %1205 = vrot.lane.b32.xlu1 %v2466_v54, %s2615_s8  ;;  %v1546_v41 = vsel %vm636_vm0, %v1544_v32, %v1545_v33  ;;  %v465_v43 = vrot.slane %v463_v39, 1  ;;  %v644_v44 = vrot.slane %v2480_v40, 1  ;;  %v2481_v45 = vld [vmem:[%s2683_s28 + $0x24] sm:$0xfe]   ;;  %v899_v56 = vshll.u32 %v2485_v47, 16  ;;  %v2497_v21 = vld [vmem:[%s2683_s28 + $0x3c] sm:$0xff]  }
  0x2c   : > { %1203 = vrot.lane.b32.xlu0 %v2465_v59, %s2615_s8  ;;  %v454_v36 = vsel %vm418_vm1, %v449_v30, %v453_v31  ;;  %v461_v38 = vor.u32 %v460_v35, %v456_v22  ;;  %v2482_v46 = vld [vmem:[%s2683_s28 + $0x2c] ss:$0 sps:$4 sm:$0x11]   ;;  %v646_v49 = vrot.slane %v2481_v45, 1  ;;  %v2483_v54 = vld [vmem:[%s2683_s28 + $0x24] sm:$0xff]   ;;  %v909_v62 = vshrl.u32 %v2487_v50, 16 }
  0x2d   : > { %v645_v51 = vsel %vm636_vm0, %v643_v42, %v644_v44  ;;  %v647_v52 = vrot.slane %v2482_v46, 1  ;;  %v2486_v55 = vld [vmem:[%s2683_s28 + $0x2c] ss:$0 sps:$4 sm:$0x11]   ;;  %v901_v59 = vrot.slane %v899_v56, 1  ;;  %v911_v63 = vshll.u32 %v2487_v50, 16 }
  0x2e   : > { %v466_v48 = vsel %vm418_vm1, %v461_v38, %v465_v43  ;;  %v904_v60 = vshll.u32 %v2486_v55, 16  ;;  %v2488_v61 = vld [vmem:[%s2683_s28 + $0x38] ss:$0 sps:$4 sm:$0x11]   ;;  %v2489_v3 = vld [vmem:[%s2683_s28 + $0x24] sm:$0xfe]  }
  0x2f   : > { %1422 = vrot.lane.b32.xlu1 %v1347_v23, %s2616_s9  ;;  %v648_v57 = vsel %vm636_vm0, %v646_v49, %v647_v52  ;;  %v902_v0 = vor.u32 %v901_v59, %v897_v53  ;;  %v916_v2 = vshll.u32 %v2488_v61, 16  ;;  %v913_v4 = vrot.slane %v911_v63, 1  ;;  %v2490_v5 = vld [vmem:[%s2683_s28 + $0x2c] ss:$0 sps:$4 sm:$0x11]   ;;  %v2493_v23 = vld [vmem:[%s2683_s28 + $0x30] sm:$0xff]  }
  0x30   : > { %1420 = vrot.lane.b32.xlu0 %v1335_v18, %s2616_s9  ;;  %v906_v1 = vrot.slane %v904_v60, 1  ;;  %v1095_v7 = vrot.slane %v2489_v3, 1  ;;  %v1096_v10 = vrot.slane %v2490_v5, 1  ;;  %v2491_v11 = vld [vmem:[%s2683_s28 + $0x30] sm:$0xfe]   ;;  %v1349_v19 = vshrl.u32 %v2495_v16, 16 }
  0x31   : > { %v918_v6 = vrot.slane %v916_v2, 1  ;;  %v914_v9 = vor.u32 %v913_v4, %v909_v62  ;;  %v2492_v12 = vld [vmem:[%s2683_s28 + $0x38] ss:$0 sps:$4 sm:$0x11]   ;;  %v1098_v14 = vrot.slane %v2491_v11, 1  ;;  %v1351_v20 = vshll.u32 %v2495_v16, 16 }
  0x32   : > { %v907_v8 = vsel %vm418_vm1, %v902_v0, %v906_v1  ;;  %v1099_v15 = vrot.slane %v2492_v12, 1  ;;  %v1097_v17 = vsel %vm636_vm0, %v1095_v7, %v1096_v10  ;;  %v2496_v18 = vld [vmem:[%s2683_s28 + $0x38] ss:$0 sps:$4 sm:$0x11]   ;;  %v2494_v24 = vld [vmem:[%s2683_s28 + $0x3c] sm:$0xff]   ;;  %v1361_v28 = vshrl.u32 %v2497_v21, 16 }
  0x33   : > { %519 = vrot.lane.b32.xlu1 %v454_v36, %s2613_s6  ;;  %v919_v13 = vsel %vm418_vm1, %v914_v9, %v918_v6  ;;  %v1353_v25 = vrot.slane %v1351_v20, 1  ;;  %v1356_v26 = vshll.u32 %v2496_v18, 16  ;;  %v2498_v27 = vld [vmem:[%s2683_s28 + $0x44] ss:$0 sps:$4 sm:$0x11]   ;;  %v2501_v30 = vld [vmem:[%s2683_s28 + $0x30] sm:$0xff]  }
  0x34   : > { %1565 = vrot.lane.b32.xlu0 %v1543_v29, %s2617_s10  ;;  %v1100_v22 = vsel %vm636_vm0, %v1098_v14, %v1099_v15  ;;  %v1363_v29 = vshll.u32 %v2497_v21, 16  ;;  %v1368_v33 = vshll.u32 %v2498_v27, 16  ;;  %v2499_v34 = vld [vmem:[%s2683_s28 + $0x30] sm:$0xfe]   ;;  %v468_v42 = vshrl.u32 %v2501_v30, 16  ;;  %v2505_v50 = vld [vmem:[%s2683_s28 + $0x3c] sm:$0xff]  }
  0x35   : > { %v1354_v31 = vor.u32 %v1353_v25, %v1349_v19  ;;  %v1358_v32 = vrot.slane %v1356_v26, 1  ;;  %v2500_v36 = vld [vmem:[%s2683_s28 + $0x38] ss:$0 sps:$4 sm:$0x11]   ;;  %v1547_v38 = vrot.slane %v2499_v34, 1  ;;  %v470_v43 = vshll.u32 %v2501_v30, 16 }
  0x36   : > { %v1365_v35 = vrot.slane %v1363_v29, 1  ;;  %v1370_v37 = vrot.slane %v1368_v33, 1  ;;  %v1548_v40 = vrot.slane %v2500_v36, 1  ;;  %v2504_v49 = vld [vmem:[%s2683_s28 + $0x44] ss:$0 sps:$4 sm:$0x11]  }
  0x37   : > { %521 = vrot.lane.b32.xlu1 %v466_v48, %s2613_s6  ;;  %v1359_v44 = vsel %vm418_vm1, %v1354_v31, %v1358_v32  ;;  %v472_v46 = vrot.slane %v470_v43, 1  ;;  %v2503_v48 = vld [vmem:[%s2683_s28 + $0x3c] sm:$0xfe]   ;;  %v1551_v55 = vrot.slane %v2504_v49, 1  ;;  %v2507_v60 = vld [vmem:[%s2683_s28 + $0x30] sm:$0xfe]  }
  0x38   : > { %1567 = vrot.lane.b32.xlu0 %v1546_v41, %s2617_s10  ;;  %v1366_v39 = vor.u32 %v1365_v35, %v1361_v28  ;;  %v2502_v41 = vld [vmem:[%s2683_s28 + $0x38] ss:$0 sps:$4 sm:$0x11]   ;;  %v1550_v53 = vrot.slane %v2503_v48, 1  ;;  %v649_v0 = vrot.slane %v2507_v60, 1  ;;  %v2513_v7 = vld [vmem:[%s2683_s28 + $0x3c] sm:$0xff]  }
  0x39   : > { %v475_v47 = vshll.u32 %v2502_v41, 16  ;;  %v2506_v56 = vld [vmem:[%s2683_s28 + $0x44] ss:$0 sps:$4 sm:$0x11]   ;;  %v2509_v5 = vld [vmem:[%s2683_s28 + $0x3c] sm:$0xfe]  }
  0x3a   : > { %v1371_v45 = vsel %vm418_vm1, %v1366_v39, %v1370_v37  ;;  %v487_v62 = vshll.u32 %v2506_v56, 16  ;;  %v2508_v63 = vld [vmem:[%s2683_s28 + $0x38] ss:$0 sps:$4 sm:$0x11]   ;;  %v1552_v1 = vsel %vm636_vm0, %v1550_v53, %v1551_v55  ;;  %v652_v9 = vrot.slane %v2509_v5, 1  ;;  %v2515_v10 = vld [vmem:[%s2683_s28 + $0x48] sm:$0xff]  }
  0x3b   : > { %667 = vrot.lane.b32.xlu1 %v648_v57, %s2612_s5  ;;  %v477_v52 = vrot.slane %v475_v47, 1  ;;  %v480_v57 = vshrl.u32 %v2505_v50, 16  ;;  %v650_v4 = vrot.slane %v2508_v63, 1  ;;  %v2510_v6 = vld [vmem:[%s2683_s28 + $0x44] ss:$0 sps:$4 sm:$0x11]  }
  0x3c   : > { %665 = vrot.lane.b32.xlu0 %v645_v51, %s2612_s5  ;;  %v473_v51 = vor.u32 %v472_v46, %v468_v42  ;;  %v489_v3 = vrot.slane %v487_v62, 1  ;;  %v653_v11 = vrot.slane %v2510_v6, 1  ;;  %v921_v12 = vshrl.u32 %v2513_v7, 16  ;;  %v2511_v19 = vld [vmem:[%s2683_s28 + $0x3c] sm:$0xff]   ;;  %v2512_v21 = vld [vmem:[%s2683_s28 + $0x48] sm:$0xff]   ;;  %v2525_v48 = vld [vmem:[%s2683_s28 + $0x54] sm:$0xff]  }
  0x3d   : > { %v923_v14 = vshll.u32 %v2513_v7, 16  ;;  %v933_v15 = vshrl.u32 %v2515_v10, 16  ;;  %v935_v18 = vshll.u32 %v2515_v10, 16  ;;  %v2517_v29 = vld [vmem:[%s2683_s28 + $0x3c] sm:$0xfe]   ;;  %v2523_v31 = vld [vmem:[%s2683_s28 + $0x48] sm:$0xff]  }
  0x3e   : > { %v478_v59 = vsel %vm418_vm1, %v473_v51, %v477_v52  ;;  %v654_v16 = vsel %vm636_vm0, %v652_v9, %v653_v11  ;;  %v2518_v30 = vld [vmem:[%s2683_s28 + $0x44] ss:$0 sps:$4 sm:$0x11]   ;;  %v1101_v33 = vrot.slane %v2517_v29, 1  ;;  %v2519_v34 = vld [vmem:[%s2683_s28 + $0x48] sm:$0xfe]  }
  0x3f   : > { %757 = vrot.lane.b32.xlu1 %v2484_v58, %s2610_s29  ;;  %v482_v58 = vshll.u32 %v2505_v50, 16  ;;  %v925_v20 = vrot.slane %v923_v14, 1  ;;  %v1102_v36 = vrot.slane %v2518_v30, 1  ;;  %v2520_v37 = vld [vmem:[%s2683_s28 + $0x50] ss:$0 sps:$4 sm:$0x11]  }
  0x40   : > { %755 = vrot.lane.b32.xlu0 %v2483_v54, %s2610_s29  ;;  %v1549_v54 = vsel %vm636_vm0, %v1547_v38, %v1548_v40  ;;  %v1104_v39 = vrot.slane %v2519_v34, 1  ;;  %v1373_v40 = vshrl.u32 %v2523_v31, 16  ;;  %v1105_v41 = vrot.slane %v2520_v37, 1  ;;  %v2521_v47 = vld [vmem:[%s2683_s28 + $0x48] sm:$0xff]   ;;  %v2522_v50 = vld [vmem:[%s2683_s28 + $0x54] sm:$0xff]  }
  0x41   : > { %v484_v61 = vrot.slane %v482_v58, 1  ;;  %v926_v25 = vor.u32 %v925_v20, %v921_v12  ;;  %v1375_v42 = vshll.u32 %v2523_v31, 16  ;;  %v1103_v43 = vsel %vm636_vm0, %v1101_v33, %v1102_v36  ;;  %v2526_v49 = vld [vmem:[%s2683_s28 + $0x5c] ss:$0 sps:$4 sm:$0x11]   ;;  %v2529_v55 = vld [vmem:[%s2683_s28 + $0x48] sm:$0xff]  }
  0x42   : > { %v1106_v46 = vsel %vm636_vm0, %v1104_v39, %v1105_v41  ;;  %v1385_v52 = vshrl.u32 %v2525_v48, 16  ;;  %v1387_v53 = vshll.u32 %v2525_v48, 16  ;;  %v2527_v58 = vld [vmem:[%s2683_s28 + $0x48] sm:$0xfe]   ;;  %v2531_v6 = vld [vmem:[%s2683_s28 + $0x54] sm:$0xfe]  }
  0x43   : > { %974 = vrot.lane.b32.xlu1 %v919_v13, %s2614_s7  ;;  %v485_v2 = vor.u32 %v484_v61, %v480_v57  ;;  %v651_v13 = vsel %vm636_vm0, %v649_v0, %v650_v4  ;;  %v1553_v62 = vrot.slane %v2527_v58, 1  ;;  %v492_v0 = vshrl.u32 %v2529_v55, 16  ;;  %v2532_v10 = vld [vmem:[%s2683_s28 + $0x5c] ss:$0 sps:$4 sm:$0x11]   ;;  %v2541_v31 = vld [vmem:[%s2683_s28 + $0x54] sm:$0xff]  }
  0x44   : > { %972 = vrot.lane.b32.xlu0 %v907_v8, %s2614_s7  ;;  %v1389_v60 = vrot.slane %v1387_v53, 1  ;;  %v494_v4 = vshll.u32 %v2529_v55, 16  ;;  %v1556_v12 = vrot.slane %v2531_v6, 1  ;;  %v2538_v30 = vld [vmem:[%s2683_s28 + $0x5c] ss:$0 sps:$4 sm:$0x11]  }
  0x45   : > { %v490_v8 = vsel %vm418_vm1, %v485_v2, %v489_v3  ;;  %v2530_v3 = vld [vmem:[%s2683_s28 + $0x50] ss:$0 sps:$4 sm:$0x11]   ;;  %v2543_v33 = vld [vmem:[%s2683_s28 + $0x60] sm:$0xff]   ;;  %v945_v36 = vshrl.u32 %v2541_v31, 16  ;;  %v947_v39 = vshll.u32 %v2541_v31, 16 }
  0x46   : > { %v1390_v2 = vor.u32 %v1389_v60, %v1385_v52  ;;  %v499_v9 = vshll.u32 %v2530_v3, 16  ;;  %v957_v41 = vshrl.u32 %v2543_v33, 16  ;;  %v2545_v52 = vld [vmem:[%s2683_s28 + $0x54] sm:$0xfe]   ;;  %v2551_v55 = vld [vmem:[%s2683_s28 + $0x60] sm:$0xff]   ;;  %v2553_v3 = vld [vmem:[%s2683_s28 + $0x6c] sm:$0xff]  }
  0x47   : > { %1119 = vrot.lane.b32.xlu1 %v1100_v22, %s2611_s30  ;;  %v2548_v60 = vld [vmem:[%s2683_s28 + $0x68] ss:$0 sps:$4 sm:$0x11]  }
  0x48   : > { %1117 = vrot.lane.b32.xlu0 %v1097_v17, %s2611_s30  ;;  %v2514_v17 = vld [vmem:[%s2683_s28 + $0x44] ss:$0 sps:$4 sm:$0x11]  }
  0x49   : > { %v928_v22 = vshll.u32 %v2514_v17, 16 }
  0x4b   : > { %1209 = vrot.lane.b32.xlu1 %v2494_v24, %s2615_s8  ;;  %v937_v24 = vrot.slane %v935_v18, 1  ;;  %v930_v26 = vrot.slane %v928_v22, 1  ;;  %v2534_v18 = vld [vmem:[%s2683_s28 + $0x5c] ss:$0 sps:$4 sm:$0x11]  }
  0x4c   : > { %1207 = vrot.lane.b32.xlu0 %v2493_v23, %s2615_s8  ;;  %v2516_v23 = vld [vmem:[%s2683_s28 + $0x50] ss:$0 sps:$4 sm:$0x11]  }
  0x4d   : > { %v938_v27 = vor.u32 %v937_v24, %v933_v15  ;;  %v940_v28 = vshll.u32 %v2516_v23, 16  ;;  %v931_v35 = vsel %vm418_vm1, %v926_v25, %v930_v26  ;;  %v501_v15 = vrot.slane %v499_v9, 1  ;;  %v2536_v24 = vld [vmem:[%s2683_s28 + $0x50] ss:$0 sps:$4 sm:$0x11]  }
  0x4e   : > { %v511_v23 = vshll.u32 %v2534_v18, 16  ;;  %v2537_v26 = vld [vmem:[%s2683_s28 + $0x54] sm:$0xfe]   ;;  %v656_v29 = vrot.slane %v2536_v24, 1 }
  0x4f   : > { %1426 = vrot.lane.b32.xlu1 %v1371_v45, %s2616_s9  ;;  %v942_v32 = vrot.slane %v940_v28, 1  ;;  %v1377_v45 = vrot.slane %v1375_v42, 1  ;;  %v959_v42 = vshll.u32 %v2543_v33, 16 }
  0x50   : > { %1424 = vrot.lane.b32.xlu0 %v1359_v44, %s2616_s9  ;;  %v2524_v44 = vld [vmem:[%s2683_s28 + $0x50] ss:$0 sps:$4 sm:$0x11]   ;;  %v513_v28 = vrot.slane %v511_v23, 1 }
  0x51   : > { %v943_v38 = vsel %vm418_vm1, %v938_v27, %v942_v32  ;;  %v1380_v51 = vshll.u32 %v2524_v44, 16  ;;  %v1378_v56 = vor.u32 %v1377_v45, %v1373_v40  ;;  %v658_v32 = vrot.slane %v2537_v26, 1 }
  0x52   : > { %v949_v44 = vrot.slane %v947_v39, 1  ;;  %v961_v48 = vrot.slane %v959_v42, 1  ;;  %v2563_v39 = vld [vmem:[%s3129_s1 + $0x8] sm:$0xff]  }
  0x53   : > { %523 = vrot.lane.b32.xlu1 %v478_v59, %s2613_s6  ;;  %v1382_v57 = vrot.slane %v1380_v51, 1  ;;  %v2528_v59 = vld [vmem:[%s2683_s28 + $0x50] ss:$0 sps:$4 sm:$0x11]  }
  0x54   : > { %1569 = vrot.lane.b32.xlu0 %v1549_v54, %s2617_s10  ;;  %v1392_v54 = vshll.u32 %v2526_v49, 16  ;;  %v1554_v63 = vrot.slane %v2528_v59, 1  ;;  %v950_v49 = vor.u32 %v949_v44, %v945_v36  ;;  %v962_v53 = vor.u32 %v961_v48, %v957_v41  ;;  %v2547_v59 = vld [vmem:[%s2683_s28 + $0x60] sm:$0xfe]   ;;  %v2568_v48 = vld [vmem:[%s2683_s28 + $0x48] sm:$0xff]  }
  0x55   : > { %v1383_v5 = vsel %vm418_vm1, %v1378_v56, %v1382_v57  ;;  %v1107_v57 = vrot.slane %v2545_v52, 1  ;;  %v2561_v36 = vld [vmem:[%s3129_s1] sm:$0xff]   ;;  %328 = vst.msk [vmem:[#allocation2 + $0x30] sm:$0xff] %vm321_vm2, %v2568_v48 }
  0x56   : > { %v1394_v61 = vrot.slane %v1392_v54, 1  ;;  %v1555_v17 = vsel %vm636_vm0, %v1553_v62, %v1554_v63  ;;  %v2546_v54 = vld [vmem:[%s2683_s28 + $0x5c] ss:$0 sps:$4 sm:$0x11]   ;;  %v1110_v63 = vrot.slane %v2547_v59, 1  ;;  %2368 = vmatprep.subr.bf16.mxu0 %v2561_v36  ;;  %2390 = vmatprep.subr.bf16.mxu1 %v2561_v36 }
  0x57   : > { %525 = vrot.lane.b32.xlu1 %v490_v8, %s2613_s6  ;;  %v496_v8 = vrot.slane %v494_v4, 1  ;;  %v1108_v58 = vrot.slane %v2546_v54, 1  ;;  %2369 = vmatpush3.bf16.msra.mxu0 %v2561_v36 }
  0x58   : > { %1571 = vrot.lane.b32.xlu0 %v1552_v1, %s2617_s10  ;;  %v2533_v1 = vld [vmem:[%s2683_s28 + $0x54] sm:$0xff]   ;;  %v1395_v7 = vsel %vm418_vm1, %v1390_v2, %v1394_v61  ;;  %v2552_v2 = vld [vmem:[%s2683_s28 + $0x68] ss:$0 sps:$4 sm:$0x11]   ;;  %2370 = vmatprep.subr.bf16.mxu0 %v2563_v39 }
  0x59   : > { %v504_v11 = vshrl.u32 %v2533_v1, 16  ;;  %v497_v14 = vor.u32 %v496_v8, %v492_v0  ;;  %v1111_v0 = vrot.slane %v2548_v60, 1  ;;  %v1109_v4 = vsel %vm636_vm0, %v1107_v57, %v1108_v58  ;;  %2393 = vmatpush3.bf16.msra.mxu1 %v2561_v36 }
  0x5a   : > { %2391 = vmatprep.subr.bf16.mxu1 %v2563_v39 }
  0x5b   : > { %671 = vrot.lane.b32.xlu1 %v654_v16, %s2612_s5  ;;  %v1557_v16 = vrot.slane %v2532_v10, 1  ;;  %v502_v20 = vsel %vm418_vm1, %v497_v14, %v501_v15  ;;  %v1112_v9 = vsel %vm636_vm0, %v1110_v63, %v1111_v0  ;;  %v2549_v10 = vld [vmem:[%s2683_s28 + $0x60] sm:$0xff]   ;;  %v1411_v14 = vshll.u32 %v2553_v3, 16  ;;  %v2550_v15 = vld [vmem:[%s2683_s28 + $0x6c] sm:$0xff]   ;;  %2371 = vmatpush3.bf16.msra.mxu0 %v2563_v39 }
  0x5c   : > { %669 = vrot.lane.b32.xlu0 %v651_v13, %s2612_s5  ;;  %v506_v13 = vshll.u32 %v2533_v1, 16  ;;  %v1399_v1 = vshll.u32 %v2551_v55, 16 }
  0x5d   : > { %v1558_v27 = vsel %vm636_vm0, %v1556_v12, %v1557_v16  ;;  %v2554_v12 = vld [vmem:[%s2683_s28 + $0x74] ss:$0 sps:$4 sm:$0x11]   ;;  %v2555_v16 = vld [vmem:[%s2683_s28] sm:$0xff]   ;;  %v1413_v18 = vrot.slane %v1411_v14, 1  ;;  %2394 = vmatpush3.bf16.msra.mxu1 %v2563_v39 }
  0x5e   : > { %v1401_v8 = vrot.slane %v1399_v1, 1  ;;  %322 = vst.msk [vmem:[#allocation2] sm:$0xff] %vm321_vm2, %v2555_v16 }
  0x5f   : > { %761 = vrot.lane.b32.xlu1 %v2512_v21, %s2610_s29  ;;  %v2535_v21 = vld [vmem:[%s2683_s28 + $0x48] sm:$0xfe]  }
  0x60   : > { %759 = vrot.lane.b32.xlu0 %v2511_v19, %s2610_s29  ;;  %v508_v19 = vrot.slane %v506_v13, 1  ;;  %v655_v25 = vrot.slane %v2535_v21, 1  ;;  %v1409_v13 = vshrl.u32 %v2553_v3, 16 }
  0x62   : > { %v509_v22 = vor.u32 %v508_v19, %v504_v11  ;;  %v657_v37 = vsel %vm636_vm0, %v655_v25, %v656_v29  ;;  %v1404_v11 = vshll.u32 %v2552_v2, 16  ;;  %v1416_v19 = vshll.u32 %v2554_v12, 16  ;;  %v2557_v25 = vld [vmem:[%s2683_s28 + $0x68] ss:$0 sps:$4 sm:$0x11]  }
  0x63   : > { %978 = vrot.lane.b32.xlu1 %v943_v38, %s2614_s7  ;;  %v2542_v38 = vld [vmem:[%s2683_s28 + $0x5c] ss:$0 sps:$4 sm:$0x11]   ;;  %v1414_v23 = vor.u32 %v1413_v18, %v1409_v13  ;;  %v2559_v29 = vld [vmem:[%s2683_s28 + $0x74] ss:$0 sps:$4 sm:$0x11]  }
  0x64   : > { %976 = vrot.lane.b32.xlu0 %v931_v35, %s2614_s7  ;;  %v514_v34 = vsel %vm418_vm1, %v509_v22, %v513_v28  ;;  %v659_v35 = vrot.slane %v2538_v30, 1  ;;  %v952_v45 = vshll.u32 %v2542_v38, 16  ;;  %v2556_v22 = vld [vmem:[%s2683_s28 + $0x60] sm:$0xfe]   ;;  %v1418_v24 = vrot.slane %v1416_v19, 1  ;;  %v2562_v38 = vld [vmem:[%s2683_s28 + $0x18] sm:$0xff]  }
  0x65   : > { %v2558_v28 = vld [vmem:[%s2683_s28 + $0x6c] sm:$0xfe]   ;;  %v1559_v31 = vrot.slane %v2556_v22, 1  ;;  %324 = vst.msk [vmem:[#allocation2 + $0x10] sm:$0xff] %vm321_vm2, %v2562_v38 }
  0x66   : > { %v660_v40 = vsel %vm636_vm0, %v658_v32, %v659_v35  ;;  %v1560_v32 = vrot.slane %v2557_v25, 1  ;;  %v1419_v33 = vsel %vm418_vm1, %v1414_v23, %v1418_v24  ;;  %v1563_v35 = vrot.slane %v2559_v29, 1 }
  0x67   : > { %1123 = vrot.lane.b32.xlu1 %v1106_v46, %s2611_s30  ;;  %v2544_v46 = vld [vmem:[%s2683_s28 + $0x68] ss:$0 sps:$4 sm:$0x11]  }
  0x68   : > { %1121 = vrot.lane.b32.xlu0 %v1103_v43, %s2611_s30  ;;  %v2539_v43 = vld [vmem:[%s2683_s28 + $0x54] sm:$0xff]   ;;  %v964_v51 = vshll.u32 %v2544_v46, 16  ;;  %v1561_v42 = vsel %vm636_vm0, %v1559_v31, %v1560_v32 }
  0x6a   : > { %v966_v56 = vrot.slane %v964_v51, 1 }
  0x6b   : > { %1213 = vrot.lane.b32.xlu1 %v2522_v50, %s2615_s8  ;;  %v954_v50 = vrot.slane %v952_v45, 1  ;;  %v2566_v45 = vld [vmem:[%s2683_s28 + $0x30] sm:$0xff]  }
  0x6c   : > { %1211 = vrot.lane.b32.xlu0 %v2521_v47, %s2615_s8  ;;  %v2540_v47 = vld [vmem:[%s2683_s28 + $0x60] sm:$0xff]   ;;  %v967_v62 = vsel %vm418_vm1, %v962_v53, %v966_v56  ;;  %326 = vst.msk [vmem:[#allocation2 + $0x20] sm:$0xff] %vm321_vm2, %v2566_v45 }
  0x6d   : > { %v955_v61 = vsel %vm418_vm1, %v950_v49, %v954_v50  ;;  %v2569_v49 = vld [vmem:[%s2683_s28 + $0x54] sm:$0xff]  }
  0x6e   : > { %329 = vst.msk [vmem:[#allocation2 + $0x38] sm:$0xff] %vm321_vm2, %v2569_v49 }
  0x6f   : > { %1430 = vrot.lane.b32.xlu1 %v1395_v7, %s2616_s9  ;;  %v1397_v7 = vshrl.u32 %v2551_v55, 16 }
  0x70   : > { %1428 = vrot.lane.b32.xlu0 %v1383_v5, %s2616_s9 }
  0x71   : > { %v1402_v21 = vor.u32 %v1401_v8, %v1397_v7 }
  0x73   : > { %527 = vrot.lane.b32.xlu1 %v502_v20, %s2613_s6  ;;  %v2560_v20 = vld [vmem:[%s2683_s28 + $0xc] sm:$0xff]  }
  0x74   : > { %1573 = vrot.lane.b32.xlu0 %v1555_v17, %s2617_s10  ;;  %v1406_v17 = vrot.slane %v1404_v11, 1  ;;  %323 = vst.msk [vmem:[#allocation2 + $0x8] sm:$0xff] %vm321_vm2, %v2560_v20 }
  0x76   : > { %v1407_v30 = vsel %vm418_vm1, %v1402_v21, %v1406_v17 }
  0x77   : > { %529 = vrot.lane.b32.xlu1 %v514_v34, %s2613_s6  ;;  %v1562_v34 = vrot.slane %v2558_v28, 1 }
  0x78   : > { %1575 = vrot.lane.b32.xlu0 %v1558_v27, %s2617_s10 }
  0x79   : > { %v1564_v44 = vsel %vm636_vm0, %v1562_v34, %v1563_v35 }
  0x7b   : > { %675 = vrot.lane.b32.xlu1 %v660_v40, %s2612_s5  ;;  %v2564_v40 = vld [vmem:[%s2683_s28 + $0x24] sm:$0xff]  }
  0x7c   : > { %673 = vrot.lane.b32.xlu0 %v657_v37, %s2612_s5  ;;  %325 = vst.msk [vmem:[#allocation2 + $0x18] sm:$0xff] %vm321_vm2, %v2564_v40 }
  0x7f   : > { %765 = vrot.lane.b32.xlu1 %v2540_v47, %s2610_s29  ;;  %v2567_v47 = vld [vmem:[%s2683_s28 + $0x3c] sm:$0xff]  }
  0x80   : > { %763 = vrot.lane.b32.xlu0 %v2539_v43, %s2610_s29  ;;  %v2565_v43 = vld [vmem:[%s3129_s1 + $0x10] ss:$0 sps:$4 sm:$0x33]   ;;  %327 = vst.msk [vmem:[#allocation2 + $0x28] sm:$0xff] %vm321_vm2, %v2567_v47 }
  0x81   : > { %2396 = vmatprep.subr.msk.bf16.mxu0 %vm1658_vm6, %v2565_v43  ;;  %v1660_v51 = vsel %vm1658_vm6, %v2565_v43, 0  ;;  %2397 = vmatprep.subr.msk.bf16.mxu1 %vm1658_vm6, %v2565_v43 }
  0x82   : > { %2373 = vmatpush3.bf16.msra.mxu0 %v1660_v51  ;;  %2395 = vmatpush3.bf16.msra.mxu1 %v1660_v51 }
  0x83   : > { %982 = vrot.lane.b32.xlu1 %v967_v62, %s2614_s7 }
  0x84   : > { %980 = vrot.lane.b32.xlu0 %v955_v61, %s2614_s7  ;;  %s253_s7 = scalar_lea.vmem %s3132_s4, %s2062_s23 }
  0x87   : > { %1127 = vrot.lane.b32.xlu1 %v1112_v9, %s2611_s30 }
  0x88   : > { %v2889_v5 = vpop.permute.xlu1 %753  ;;  %v2891_v6 = vpop.permute.xlu0 %751  ;;  %1125 = vrot.lane.b32.xlu0 %v1109_v4, %s2611_s30  ;;  %s3028_s30 = scalar_lea.vmem %s3131_s3, %s2060_s27 }
  0x8b   : > { %1217 = vrot.lane.b32.xlu1 %v2550_v15, %s2615_s8 }
  0x8c   : > { %v2905_v26 = vpop.permute.xlu0 %1113  ;;  %1215 = vrot.lane.b32.xlu0 %v2549_v10, %s2615_s8 }
  0x8d   : > { %v662_v27 = vpop.permute.xlu1 %661 }
  0x8f   : > { %1434 = vrot.lane.b32.xlu1 %v1419_v33, %s2616_s9 }
  0x90   : > { %1432 = vrot.lane.b32.xlu0 %v1407_v30, %s2616_s9 }
  0x91   : > { %v664_v37 = vpop.permute.xlu1 %663 }
  0x92   : > { %v516_v41 = vpop.permute.xlu0 %515 }
  0x93   : > { %540 = vst.msk [vmem:[#allocation2] sm:$0xff] %vm539_vm3, %v516_v41  ;;  %1579 = vrot.lane.b32.xlu1 %v1564_v44, %s2617_s10 }
  0x94   : > { %686 = vst.msk [vmem:[#allocation2] sm:$0xff] %vm685_vm4, %v662_v27  ;;  %1577 = vrot.lane.b32.xlu0 %v1561_v42, %s2617_s10 }
  0x95   : > { %v1116_v46 = vpop.permute.xlu1 %1115  ;;  %776 = vst.msk [vmem:[#allocation2] sm:$0xff] %vm775_vm5, %v2891_v6 }
  0x96   : > { %v518_v50 = vpop.permute.xlu0 %517 }
  0x97   : > { %541 = vst.msk [vmem:[#allocation2 + $0x8] sm:$0xff] %vm539_vm3, %v518_v50 }
  0x98   : > { %687 = vst.msk [vmem:[#allocation2 + $0x8] sm:$0xff] %vm685_vm4, %v664_v37 }
  0x99   : > { %v971_v52 = vpop.permute.xlu1 %970  ;;  %777 = vst.msk [vmem:[#allocation2 + $0x8] sm:$0xff] %vm775_vm5, %v2889_v5 }
  0x9a   : > { %994 = vst.msk [vmem:[#allocation2 + $0x8] sm:$0xff] %vm992_vm7, %v971_v52  ;;  %v969_v53 = vpop.permute.xlu0 %968  ;;  %v3022_v52 = vld [vmem:[%s3130_s2] ss:$0 sm:$0xff] }
  0x9b   : > { %993 = vst.msk [vmem:[#allocation2] sm:$0xff] %vm992_vm7, %v969_v53 }
  0x9c   : > { %1139 = vst.msk [vmem:[#allocation2 + $0x8] sm:$0xff] %vm1137_vm8, %v1116_v46  ;;  %1138 = vst.msk [vmem:[#allocation2] sm:$0xff] %vm1137_vm8, %v2905_v26 }
  0x9d   : > { %v1206_v54 = vpop.permute.xlu1 %1205 }
  0x9e   : > { %1229 = vst.msk [vmem:[#allocation2 + $0x8] sm:$0xff] %vm1227_vm9, %v1206_v54  ;;  %v1204_v55 = vpop.permute.xlu0 %1203 }
  0x9f   : > { %1228 = vst.msk [vmem:[#allocation2] sm:$0xff] %vm1227_vm9, %v1204_v55 }
  0xa1   : > { %v1423_v56 = vpop.permute.xlu1 %1422 }
  0xa2   : > { %v1421_v57 = vpop.permute.xlu0 %1420  ;;  %1446 = vst.msk [vmem:[#allocation2 + $0x8] sm:$0xff] %vm1444_vm10, %v1423_v56 }
  0xa3   : > { %1445 = vst.msk [vmem:[#allocation2] sm:$0xff] %vm1444_vm10, %v1421_v57 }
  0xa5   : > { %v520_v59 = vpop.permute.xlu1 %519 }
  0xa6   : > { %v1566_v58 = vpop.permute.xlu0 %1565  ;;  %542 = vst.msk [vmem:[#allocation2 + $0x10] sm:$0xff] %vm539_vm3, %v520_v59 }
  0xa7   : > { %1590 = vst.msk [vmem:[#allocation2] sm:$0xff] %vm1589_vm11, %v1566_v58 }
  0xa9   : > { %v522_v61 = vpop.permute.xlu1 %521 }
  0xaa   : > { %v1568_v60 = vpop.permute.xlu0 %1567  ;;  %543 = vst.msk [vmem:[#allocation2 + $0x18] sm:$0xff] %vm539_vm3, %v522_v61 }
  0xab   : > { %1591 = vst.msk [vmem:[#allocation2 + $0x8] sm:$0xff] %vm1589_vm11, %v1568_v60 }
  0xad   : > { %v668_v0 = vpop.permute.xlu1 %667 }
  0xae   : > { %v666_v62 = vpop.permute.xlu0 %665  ;;  %v1598_v63 = vld [vmem:[#allocation2] sm:$0xff]  ;;  %689 = vst.msk [vmem:[#allocation2 + $0x18] sm:$0xff] %vm685_vm4, %v668_v0 }
  0xaf   : > { %688 = vst.msk [vmem:[#allocation2 + $0x10] sm:$0xff] %vm685_vm4, %v666_v62  ;;  %2374 = vmatprep.mubr.msk.bf16.mxu0 %vm1633_vm12, %v1598_v63 }
  0xb1   : > { %v758_v3 = vpop.permute.xlu1 %757 }
  0xb2   : > { %v756_v1 = vpop.permute.xlu0 %755  ;;  %v1599_v2 = vld [vmem:[#allocation2 + $0x8] sm:$0xff]  ;;  %779 = vst.msk [vmem:[#allocation2 + $0x18] sm:$0xff] %vm775_vm5, %v758_v3 }
  0xb3   : > { %778 = vst.msk [vmem:[#allocation2 + $0x10] sm:$0xff] %vm775_vm5, %v756_v1  ;;  %2375 = vmatmul.mubr.msk.bf16.vlgmr.msra.gmra.mrb[0].mxu0 %vm1633_vm12, %v1599_v2 }
  0xb5   : > { %v975_v5 = vpop.permute.xlu1 %974 }
  0xb6   : > { %v973_v4 = vpop.permute.xlu0 %972  ;;  %996 = vst.msk [vmem:[#allocation2 + $0x18] sm:$0xff] %vm992_vm7, %v975_v5 }
  0xb7   : > { %995 = vst.msk [vmem:[#allocation2 + $0x10] sm:$0xff] %vm992_vm7, %v973_v4 }
  0xb9   : > { %v1120_v7 = vpop.permute.xlu1 %1119 }
  0xba   : > { %v1118_v6 = vpop.permute.xlu0 %1117  ;;  %1141 = vst.msk [vmem:[#allocation2 + $0x18] sm:$0xff] %vm1137_vm8, %v1120_v7 }
  0xbb   : > { %1140 = vst.msk [vmem:[#allocation2 + $0x10] sm:$0xff] %vm1137_vm8, %v1118_v6 }
  0xbd   : > { %v1210_v9 = vpop.permute.xlu1 %1209 }
  0xbe   : > { %v1208_v8 = vpop.permute.xlu0 %1207  ;;  %1231 = vst.msk [vmem:[#allocation2 + $0x18] sm:$0xff] %vm1227_vm9, %v1210_v9 }
  0xbf   : > { %1230 = vst.msk [vmem:[#allocation2 + $0x10] sm:$0xff] %vm1227_vm9, %v1208_v8 }
  0xc1   : > { %v1427_v11 = vpop.permute.xlu1 %1426 }
  0xc2   : > { %v1425_v10 = vpop.permute.xlu0 %1424  ;;  %1448 = vst.msk [vmem:[#allocation2 + $0x18] sm:$0xff] %vm1444_vm10, %v1427_v11 }
  0xc3   : > { %1447 = vst.msk [vmem:[#allocation2 + $0x10] sm:$0xff] %vm1444_vm10, %v1425_v10 }
  0xc5   : > { %v524_v13 = vpop.permute.xlu1 %523 }
  0xc6   : > { %v1570_v12 = vpop.permute.xlu0 %1569  ;;  %544 = vst.msk [vmem:[#allocation2 + $0x20] sm:$0xff] %vm539_vm3, %v524_v13 }
  0xc7   : > { %1592 = vst.msk [vmem:[#allocation2 + $0x10] sm:$0xff] %vm1589_vm11, %v1570_v12 }
  0xc9   : > { %v526_v15 = vpop.permute.xlu1 %525 }
  0xca   : > { %v1572_v14 = vpop.permute.xlu0 %1571  ;;  %545 = vst.msk [vmem:[#allocation2 + $0x28] sm:$0xff] %vm539_vm3, %v526_v15 }
  0xcb   : > { %1593 = vst.msk [vmem:[#allocation2 + $0x18] sm:$0xff] %vm1589_vm11, %v1572_v14 }
  0xcd   : > { %v672_v18 = vpop.permute.xlu1 %671 }
  0xce   : > { %v670_v16 = vpop.permute.xlu0 %669  ;;  %v1600_v17 = vld [vmem:[#allocation2 + $0x10] sm:$0xff]  ;;  %691 = vst.msk [vmem:[#allocation2 + $0x28] sm:$0xff] %vm685_vm4, %v672_v18 }
  0xcf   : > { %690 = vst.msk [vmem:[#allocation2 + $0x20] sm:$0xff] %vm685_vm4, %v670_v16  ;;  %2378 = vmatprep.mubr.msk.bf16.mxu0 %vm1633_vm12, %v1600_v17 }
  0xd1   : > { %v762_v21 = vpop.permute.xlu1 %761 }
  0xd2   : > { %v760_v19 = vpop.permute.xlu0 %759  ;;  %v1601_v20 = vld [vmem:[#allocation2 + $0x18] sm:$0xff]  ;;  %781 = vst.msk [vmem:[#allocation2 + $0x28] sm:$0xff] %vm775_vm5, %v762_v21 }
  0xd3   : > { %780 = vst.msk [vmem:[#allocation2 + $0x20] sm:$0xff] %vm775_vm5, %v760_v19  ;;  %2379 = vmatmul.mubr.msk.bf16.gmra.mrb[4].mxu0 %vm1633_vm12, %v1601_v20 }
  0xd5   : > { %v979_v23 = vpop.permute.xlu1 %978 }
  0xd6   : > { %v977_v22 = vpop.permute.xlu0 %976  ;;  %998 = vst.msk [vmem:[#allocation2 + $0x28] sm:$0xff] %vm992_vm7, %v979_v23 }
  0xd7   : > { %997 = vst.msk [vmem:[#allocation2 + $0x20] sm:$0xff] %vm992_vm7, %v977_v22 }
  0xd9   : > { %v1124_v25 = vpop.permute.xlu1 %1123 }
  0xda   : > { %v1122_v24 = vpop.permute.xlu0 %1121  ;;  %1143 = vst.msk [vmem:[#allocation2 + $0x28] sm:$0xff] %vm1137_vm8, %v1124_v25 }
  0xdb   : > { %1142 = vst.msk [vmem:[#allocation2 + $0x20] sm:$0xff] %vm1137_vm8, %v1122_v24 }
  0xdd   : > { %v1214_v27 = vpop.permute.xlu1 %1213 }
  0xde   : > { %v1212_v26 = vpop.permute.xlu0 %1211  ;;  %1233 = vst.msk [vmem:[#allocation2 + $0x28] sm:$0xff] %vm1227_vm9, %v1214_v27 }
  0xdf   : > { %1232 = vst.msk [vmem:[#allocation2 + $0x20] sm:$0xff] %vm1227_vm9, %v1212_v26 }
  0xe1   : > { %v1431_v29 = vpop.permute.xlu1 %1430 }
  0xe2   : > { %v1429_v28 = vpop.permute.xlu0 %1428  ;;  %1450 = vst.msk [vmem:[#allocation2 + $0x28] sm:$0xff] %vm1444_vm10, %v1431_v29 }
  0xe3   : > { %1449 = vst.msk [vmem:[#allocation2 + $0x20] sm:$0xff] %vm1444_vm10, %v1429_v28 }
  0xe5   : > { %v528_v31 = vpop.permute.xlu1 %527 }
  0xe6   : > { %v1574_v30 = vpop.permute.xlu0 %1573  ;;  %546 = vst.msk [vmem:[#allocation2 + $0x30] sm:$0xff] %vm539_vm3, %v528_v31 }
  0xe7   : > { %1594 = vst.msk [vmem:[#allocation2 + $0x20] sm:$0xff] %vm1589_vm11, %v1574_v30 }
  0xe9   : > { %v530_v33 = vpop.permute.xlu1 %529 }
  0xea   : > { %v1576_v32 = vpop.permute.xlu0 %1575  ;;  %547 = vst.msk [vmem:[#allocation2 + $0x38] sm:$0xff] %vm539_vm3, %v530_v33 }
  0xeb   : > { %1595 = vst.msk [vmem:[#allocation2 + $0x28] sm:$0xff] %vm1589_vm11, %v1576_v32 }
  0xed   : > { %v676_v36 = vpop.permute.xlu1 %675 }
  0xee   : > { %v674_v34 = vpop.permute.xlu0 %673  ;;  %v1602_v35 = vld [vmem:[#allocation2 + $0x20] sm:$0xff]  ;;  %693 = vst.msk [vmem:[#allocation2 + $0x38] sm:$0xff] %vm685_vm4, %v676_v36 }
  0xef   : > { %692 = vst.msk [vmem:[#allocation2 + $0x30] sm:$0xff] %vm685_vm4, %v674_v34  ;;  %2382 = vmatprep.mubr.msk.bf16.mxu1 %vm1633_vm12, %v1602_v35 }
  0xf1   : > { %v766_v39 = vpop.permute.xlu1 %765 }
  0xf2   : > { %v764_v37 = vpop.permute.xlu0 %763  ;;  %v1603_v38 = vld [vmem:[#allocation2 + $0x28] sm:$0xff]  ;;  %783 = vst.msk [vmem:[#allocation2 + $0x38] sm:$0xff] %vm775_vm5, %v766_v39 }
  0xf3   : > { %782 = vst.msk [vmem:[#allocation2 + $0x30] sm:$0xff] %vm775_vm5, %v764_v37  ;;  %2383 = vmatmul.mubr.msk.bf16.vlgmr.msra.gmra.mrb[0].mxu1 %vm1633_vm12, %v1603_v38 }
  0xf5   : > { %v983_v41 = vpop.permute.xlu1 %982 }
  0xf6   : > { %v981_v40 = vpop.permute.xlu0 %980  ;;  %1000 = vst.msk [vmem:[#allocation2 + $0x38] sm:$0xff] %vm992_vm7, %v983_v41 }
  0xf7   : > { %999 = vst.msk [vmem:[#allocation2 + $0x30] sm:$0xff] %vm992_vm7, %v981_v40 }
  0xf9   : > { %v1128_v43 = vpop.permute.xlu1 %1127 }
  0xfa   : > { %v1126_v42 = vpop.permute.xlu0 %1125  ;;  %1145 = vst.msk [vmem:[#allocation2 + $0x38] sm:$0xff] %vm1137_vm8, %v1128_v43 }
  0xfb   : > { %1144 = vst.msk [vmem:[#allocation2 + $0x30] sm:$0xff] %vm1137_vm8, %v1126_v42 }
  0xfd   : > { %v1218_v45 = vpop.permute.xlu1 %1217 }
  0xfe   : > { %v1216_v44 = vpop.permute.xlu0 %1215  ;;  %1235 = vst.msk [vmem:[#allocation2 + $0x38] sm:$0xff] %vm1227_vm9, %v1218_v45 }
  0xff   : > { %1234 = vst.msk [vmem:[#allocation2 + $0x30] sm:$0xff] %vm1227_vm9, %v1216_v44 }
 0x101   : > { %v1435_v47 = vpop.permute.xlu1 %1434 }
 0x102   : > { %v1433_v46 = vpop.permute.xlu0 %1432  ;;  %1452 = vst.msk [vmem:[#allocation2 + $0x38] sm:$0xff] %vm1444_vm10, %v1435_v47 }
 0x103   : > { %1451 = vst.msk [vmem:[#allocation2 + $0x30] sm:$0xff] %vm1444_vm10, %v1433_v46 }
 0x105   : > { %v1580_v49 = vpop.permute.xlu1 %1579 }
 0x106   : > { %v1578_v48 = vpop.permute.xlu0 %1577  ;;  %1597 = vst.msk [vmem:[#allocation2 + $0x38] sm:$0xff] %vm1589_vm11, %v1580_v49 }
 0x107   : > { %1596 = vst.msk [vmem:[#allocation2 + $0x30] sm:$0xff] %vm1589_vm11, %v1578_v48 }
 0x10d   : > { %v1605_v51 = vld [vmem:[#allocation2 + $0x38] sm:$0xff] }
 0x10e   : > { %v1604_v50 = vld [vmem:[#allocation2 + $0x30] sm:$0xff] }
 0x10f   : > { %2386 = vmatprep.mubr.msk.bf16.mxu1 %vm1633_vm12, %v1604_v50 }
 0x110   : > { %2387 = vmatmul.mubr.msk.bf16.gmra.mrb[4].mxu1 %vm1633_vm12, %v1605_v51 }
 0x186   : > { %v2376_v53 = vpop.f32.mrb[0].mxu0 }
 0x187   : > { %v1705_v54 = vadd.f32 %v2376_v53, %v3022_v52  ;;  %v1696_v55 = vpop.f32.mrb[1].mxu0 }
 0x188   : > { %v1697_v56 = vadd.f32 %v3022_v52, %v1696_v55  ;;  %v2377_v57 = vpop.f32.mrb[2].mxu0 }
 0x189   : > { %v2343_v58 = vpack.c.bf16 %v1705_v54, %v1705_v54  ;;  %v1708_v59 = vadd.f32 %v2377_v57, %v3022_v52  ;;  %v1699_v60 = vpop.f32.mrb[3].mxu0  ;;  %v1801_v0 = vmul.f32 %v1705_v54, %v1705_v54  ;;  %v1763_v7 = vsel %vm1759_vm14, %v1705_v54, 0.0 }
 0x18a   : > { %v1799_v61 = vmul.f32 %v1697_v56, %v1697_v56  ;;  %v2341_v62 = vpack.c.bf16 %v1697_v56, %v1697_v56  ;;  %v1700_v63 = vadd.f32 %v3022_v52, %v1699_v60  ;;  %v1760_v2 = vsel %vm1759_vm14, %v1697_v56, 0.0 }
 0x18b   : > { %1920 = vst.msk [vmem:[%s3028_s30 + $0x8] sm:$0xf] %vm1917_vm13, %v2343_v58  ;;  %v2344_v1 = vpack.c.bf16 %v1708_v59, %v1708_v59  ;;  %v1802_v9 = vmul.f32 %v1708_v59, %v1708_v59  ;;  %v1818_v13 = vsel %vm1759_vm14, %v1801_v0, 0.0  ;;  %v1765_v14 = vsel %vm1759_vm14, %v1708_v59, 0.0 }
 0x18c   : > { %1918 = vst.msk [vmem:[%s3028_s30] sm:$0xf] %vm1917_vm13, %v2341_v62  ;;  %v1761_v3 = vsel %vm1759_vm14, %v1700_v63, 0.0  ;;  %v1800_v4 = vmul.f32 %v1700_v63, %v1700_v63  ;;  %v2342_v5 = vpack.c.bf16 %v1700_v63, %v1700_v63  ;;  %v1815_v8 = vsel %vm1759_vm14, %v1799_v61, 0.0 }
 0x18d   : > { %1921 = vst.msk [vmem:[%s3028_s30 + $0xc] sm:$0xf] %vm1917_vm13, %v2344_v1  ;;  %v1762_v6 = vadd.f32 %v1761_v3, %v1760_v2  ;;  %v1820_v17 = vsel %vm1759_vm14, %v1802_v9, 0.0 }
 0x18e   : > { %v1816_v10 = vsel %vm1759_vm14, %v1800_v4, 0.0  ;;  %1919 = vst.msk [vmem:[%s3028_s30 + $0x4] sm:$0xf] %vm1917_vm13, %v2342_v5 }
 0x18f   : > { %v1764_v11 = vadd.f32 %v1763_v7, %v1762_v6  ;;  %v1817_v12 = vadd.f32 %v1816_v10, %v1815_v8 }
 0x191   : > { %v1819_v15 = vadd.f32 %v1818_v13, %v1817_v12  ;;  %v1766_v16 = vadd.f32 %v1765_v14, %v1764_v11 }
 0x193   : > { %v1821_v18 = vadd.f32 %v1820_v17, %v1819_v15 }
 0x1a6   : > { %v2380_v19 = vpop.f32.mrb[4].mxu0 }
 0x1a7   : > { %v1721_v20 = vadd.f32 %v2380_v19, %v3022_v52  ;;  %v1712_v21 = vpop.f32.mrb[5].mxu0 }
 0x1a8   : > { %v1713_v22 = vadd.f32 %v3022_v52, %v1712_v21  ;;  %v2381_v23 = vpop.f32.mrb[6].mxu0 }
 0x1a9   : > { %v2347_v24 = vpack.c.bf16 %v1721_v20, %v1721_v20  ;;  %v1724_v25 = vadd.f32 %v2381_v23, %v3022_v52  ;;  %v1715_v26 = vpop.f32.mrb[7].mxu0  ;;  %v1805_v31 = vmul.f32 %v1721_v20, %v1721_v20  ;;  %v1771_v40 = vsel %vm1759_vm14, %v1721_v20, 0.0 }
 0x1aa   : > { %v1767_v27 = vsel %vm1759_vm14, %v1713_v22, 0.0  ;;  %v1803_v28 = vmul.f32 %v1713_v22, %v1713_v22  ;;  %v2345_v29 = vpack.c.bf16 %v1713_v22, %v1713_v22  ;;  %v1716_v30 = vadd.f32 %v3022_v52, %v1715_v26 }
 0x1ab   : > { %1924 = vst.msk [vmem:[%s3028_s30 + $0x18] sm:$0xf] %vm1917_vm13, %v2347_v24  ;;  %v1768_v32 = vadd.f32 %v1767_v27, %v1766_v16  ;;  %v2348_v34 = vpack.c.bf16 %v1724_v25, %v1724_v25  ;;  %v1806_v41 = vmul.f32 %v1724_v25, %v1724_v25  ;;  %v1826_v45 = vsel %vm1759_vm14, %v1805_v31, 0.0 }
 0x1ac   : > { %v1822_v33 = vsel %vm1759_vm14, %v1803_v28, 0.0  ;;  %1922 = vst.msk [vmem:[%s3028_s30 + $0x10] sm:$0xf] %vm1917_vm13, %v2345_v29  ;;  %v1769_v35 = vsel %vm1759_vm14, %v1716_v30, 0.0  ;;  %v1804_v36 = vmul.f32 %v1716_v30, %v1716_v30  ;;  %v2346_v39 = vpack.c.bf16 %v1716_v30, %v1716_v30 }
 0x1ad   : > { %v1823_v37 = vadd.f32 %v1822_v33, %v1821_v18  ;;  %v1770_v38 = vadd.f32 %v1769_v35, %v1768_v32  ;;  %1925 = vst.msk [vmem:[%s3028_s30 + $0x1c] sm:$0xf] %vm1917_vm13, %v2348_v34  ;;  %v1773_v46 = vsel %vm1759_vm14, %v1724_v25, 0.0  ;;  %v1828_v49 = vsel %vm1759_vm14, %v1806_v41, 0.0 }
 0x1ae   : > { %v1824_v42 = vsel %vm1759_vm14, %v1804_v36, 0.0  ;;  %1923 = vst.msk [vmem:[%s3028_s30 + $0x14] sm:$0xf] %vm1917_vm13, %v2346_v39 }
 0x1af   : > { %v1772_v43 = vadd.f32 %v1771_v40, %v1770_v38  ;;  %v1825_v44 = vadd.f32 %v1824_v42, %v1823_v37 }
 0x1b1   : > { %v1827_v47 = vadd.f32 %v1826_v45, %v1825_v44  ;;  %v1774_v48 = vadd.f32 %v1773_v46, %v1772_v43 }
 0x1b3   : > { %v1829_v50 = vadd.f32 %v1828_v49, %v1827_v47 }
 0x1c6   : > { %v2384_v51 = vpop.f32.mrb[0].mxu1 }
 0x1c7   : > { %v1737_v53 = vadd.f32 %v2384_v51, %v3022_v52  ;;  %v1728_v54 = vpop.f32.mrb[1].mxu1 }
 0x1c8   : > { %v1729_v55 = vadd.f32 %v3022_v52, %v1728_v54  ;;  %v2385_v56 = vpop.f32.mrb[2].mxu1 }
 0x1c9   : > { %v2351_v57 = vpack.c.bf16 %v1737_v53, %v1737_v53  ;;  %v1740_v58 = vadd.f32 %v2385_v56, %v3022_v52  ;;  %v1731_v59 = vpop.f32.mrb[3].mxu1  ;;  %v1809_v0 = vmul.f32 %v1737_v53, %v1737_v53  ;;  %v1779_v9 = vsel %vm1759_vm14, %v1737_v53, 0.0 }
 0x1ca   : > { %v1775_v60 = vsel %vm1759_vm14, %v1729_v55, 0.0  ;;  %v1807_v61 = vmul.f32 %v1729_v55, %v1729_v55  ;;  %v2349_v62 = vpack.c.bf16 %v1729_v55, %v1729_v55  ;;  %v1732_v63 = vadd.f32 %v3022_v52, %v1731_v59 }
 0x1cb   : > { %1928 = vst.msk [vmem:[%s3028_s30 + $0x28] sm:$0xf] %vm1917_vm13, %v2351_v57  ;;  %v1776_v1 = vadd.f32 %v1775_v60, %v1774_v48  ;;  %v2352_v3 = vpack.c.bf16 %v1740_v58, %v1740_v58  ;;  %v1810_v10 = vmul.f32 %v1740_v58, %v1740_v58  ;;  %v1834_v14 = vsel %vm1759_vm14, %v1809_v0, 0.0 }
 0x1cc   : > { %v1830_v2 = vsel %vm1759_vm14, %v1807_v61, 0.0  ;;  %1926 = vst.msk [vmem:[%s3028_s30 + $0x20] sm:$0xf] %vm1917_vm13, %v2349_v62  ;;  %v1777_v4 = vsel %vm1759_vm14, %v1732_v63, 0.0  ;;  %v1808_v5 = vmul.f32 %v1732_v63, %v1732_v63  ;;  %v2350_v8 = vpack.c.bf16 %v1732_v63, %v1732_v63 }
 0x1cd   : > { %v1831_v6 = vadd.f32 %v1830_v2, %v1829_v50  ;;  %v1778_v7 = vadd.f32 %v1777_v4, %v1776_v1  ;;  %1929 = vst.msk [vmem:[%s3028_s30 + $0x2c] sm:$0xf] %vm1917_vm13, %v2352_v3  ;;  %v1781_v15 = vsel %vm1759_vm14, %v1740_v58, 0.0  ;;  %v1836_v18 = vsel %vm1759_vm14, %v1810_v10, 0.0 }
 0x1ce   : > { %v1832_v11 = vsel %vm1759_vm14, %v1808_v5, 0.0  ;;  %1927 = vst.msk [vmem:[%s3028_s30 + $0x24] sm:$0xf] %vm1917_vm13, %v2350_v8 }
 0x1cf   : > { %v1780_v12 = vadd.f32 %v1779_v9, %v1778_v7  ;;  %v1833_v13 = vadd.f32 %v1832_v11, %v1831_v6 }
 0x1d1   : > { %v1835_v16 = vadd.f32 %v1834_v14, %v1833_v13  ;;  %v1782_v17 = vadd.f32 %v1781_v15, %v1780_v12 }
 0x1d3   : > { %v1837_v19 = vadd.f32 %v1836_v18, %v1835_v16 }
 0x1e3   : > { %v2388_v20 = vpop.f32.mrb[4].mxu1 }
 0x1e4   : > { %v1753_v21 = vadd.f32 %v2388_v20, %v3022_v52  ;;  %v1744_v22 = vpop.f32.mrb[5].mxu1 }
 0x1e5   : > { %v1745_v23 = vadd.f32 %v3022_v52, %v1744_v22  ;;  %v2389_v24 = vpop.f32.mrb[6].mxu1 }
 0x1e6   : > { %v2355_v25 = vpack.c.bf16 %v1753_v21, %v1753_v21  ;;  %v1756_v26 = vadd.f32 %v2389_v24, %v3022_v52  ;;  %v1747_v27 = vpop.f32.mrb[7].mxu1  ;;  %v1813_v32 = vmul.f32 %v1753_v21, %v1753_v21  ;;  %v1787_v41 = vsel %vm1759_vm14, %v1753_v21, 0.0 }
 0x1e7   : > { %v1783_v28 = vsel %vm1759_vm14, %v1745_v23, 0.0  ;;  %v1811_v29 = vmul.f32 %v1745_v23, %v1745_v23  ;;  %v2353_v30 = vpack.c.bf16 %v1745_v23, %v1745_v23  ;;  %v1748_v31 = vadd.f32 %v3022_v52, %v1747_v27 }
 0x1e8   : > { %1932 = vst.msk [vmem:[%s3028_s30 + $0x38] sm:$0xf] %vm1917_vm13, %v2355_v25  ;;  %v1784_v33 = vadd.f32 %v1783_v28, %v1782_v17  ;;  %v2356_v35 = vpack.c.bf16 %v1756_v26, %v1756_v26  ;;  %v1814_v42 = vmul.f32 %v1756_v26, %v1756_v26  ;;  %v1842_v45 = vsel %vm1759_vm14, %v1813_v32, 0.0 }
 0x1e9   : > { %v1838_v34 = vsel %vm1759_vm14, %v1811_v29, 0.0  ;;  %1930 = vst.msk [vmem:[%s3028_s30 + $0x30] sm:$0xf] %vm1917_vm13, %v2353_v30  ;;  %v1785_v36 = vsel %vm1759_vm14, %v1748_v31, 0.0  ;;  %v1812_v37 = vmul.f32 %v1748_v31, %v1748_v31  ;;  %v2354_v40 = vpack.c.bf16 %v1748_v31, %v1748_v31 }
 0x1ea   : > { %v1839_v38 = vadd.f32 %v1838_v34, %v1837_v19  ;;  %v1786_v39 = vadd.f32 %v1785_v36, %v1784_v33  ;;  %1933 = vst.msk [vmem:[%s3028_s30 + $0x3c] sm:$0xf] %vm1917_vm13, %v2356_v35  ;;  %v1789_v46 = vsel %vm1759_vm14, %v1756_v26, 0.0  ;;  %v1844_v49 = vsel %vm1759_vm14, %v1814_v42, 0.0 }
 0x1eb   : > { %v1840_v52 = vsel %vm1759_vm14, %v1812_v37, 0.0  ;;  %1931 = vst.msk [vmem:[%s3028_s30 + $0x34] sm:$0xf] %vm1917_vm13, %v2354_v40 }
 0x1ec   : > { %v1788_v43 = vadd.f32 %v1787_v41, %v1786_v39  ;;  %v1841_v44 = vadd.f32 %v1840_v52, %v1839_v38 }
 0x1ee   : > { %v1790_v47 = vadd.f32 %v1789_v46, %v1788_v43  ;;  %v1843_v48 = vadd.f32 %v1842_v45, %v1841_v44 }
 0x1f0   : > { %v1791_v50 = vrot.slane %v1790_v47, 4  ;;  %v1845_v51 = vadd.f32 %v1844_v49, %v1843_v48 }
 0x1f2   : > { %v1792_v53 = vadd.f32 %v1791_v50, %v1790_v47  ;;  %v1846_v54 = vrot.slane %v1845_v51, 4 }
 0x1f4   : > { %v1793_v55 = vrot.slane %v1792_v53, 2  ;;  %v1847_v56 = vadd.f32 %v1846_v54, %v1845_v51 }
 0x1f6   : > { %v1794_v57 = vadd.f32 %v1793_v55, %v1792_v53  ;;  %v1848_v58 = vrot.slane %v1847_v56, 2 }
 0x1f8   : > { %v1795_v59 = vrot.slane %v1794_v57, 1  ;;  %v1849_v60 = vadd.f32 %v1848_v58, %v1847_v56 }
 0x1fa   : > { %v1796_v61 = vadd.f32 %v1795_v59, %v1794_v57  ;;  %v1850_v62 = vrot.slane %v1849_v60, 1 }
 0x1fc   : > { %1798 = vst.msk [vmem:[%s253_s7] sm:$0x1] %vm1797_vm15, %v1796_v61  ;;  %v1851_v63 = vadd.f32 %v1850_v62, %v1849_v60 }
 0x1fe   : > { %1852 = vst.msk [vmem:[%s253_s7 + $0x1] sm:$0x1] %vm1797_vm15, %v1851_v63 }
 0x1ff PF: > { %s15_s19 = sadd.s32 1, %s2608_s19   ;;  %s3133_s15 = smov %s2600_s17 }
 0x200   : > { %p12_p7 = scmp.ge.s32.totalorder %s15_s19, 6   ;;  %s3134_s16 = smov %s2604_s18 }
 0x201   : > { %s3135_s17 = smov %s3138_s20  ;;  %s3136_s18 = smov %s3142_s21 }
 0x202   :  { %14 = sbr.rel (!%p12_p7) target bundleno = 3 (0x3), region = 76 }

</bundles_post_ra>
